<compile_context>
chip_gen: v5e
topology: v5e:2x2
jax: 0.10.0
libtpu: 0.0.40
codegen_flags: <defaults>
</compile_context>

<pallas_src>
import functools

import jax
import jax.numpy as jnp
from jax import lax
from jax.experimental import pallas as pl
from jax.experimental.pallas import tpu as pltpu


def _linear_attention_kernel(x_ref, wqkv_ref, wout_ref, bout_ref, out_ref, *,
                             heads, dim_head):
    # x_ref:    (1, C, N)   bf16; channels on sublanes, spatial on lanes
    # wqkv_ref: (C, 3*H*D)  bf16; lane-dense fused to_qkv weight (transposed)
    # wout_ref: (C, H*D)    bf16; to_out 1x1 conv weight (already lane-dense)
    # bout_ref: (C, 1)      f32;  to_out bias
    # out_ref:  (1, C, N)   f32
    n = x_ref.shape[-1]
    x = x_ref[0]                                      # (C, N) bf16
    wqkv = wqkv_ref[...]                              # (C, 3HD) bf16

    # to_qkv: 1x1 conv == channel matmul on the MXU; contract the channel
    # axis (axis 0 of both operands), f32 accumulate.  K = C is tiny, so the
    # MXU is latency- not throughput-bound here; acceptable at these sizes.
    qkv = lax.dot_general(wqkv, x, (((0,), (0,)), ((), ())),
                          preferred_element_type=jnp.float32)    # (3HD, N) f32
    qkv = qkv.reshape(3, heads, dim_head, n)          # (3, H, D, N) — sublane-safe split
    q, k, v = qkv[0], qkv[1], qkv[2]                  # each (H, D, N) f32

    # Softmax over the spatial (lane) axis in f32; divide moved onto the EUP
    # via the approximate reciprocal.
    k_max = jnp.max(k, axis=-1, keepdims=True)
    k_exp = jnp.exp(k - k_max)
    k_sum = jnp.sum(k_exp, axis=-1, keepdims=True)
    k_sm = k_exp * pl.reciprocal(k_sum, approx=True)  # (H, D, N)

    # Heads-batched contractions (no per-head loop, no concat copy).
    # ctx[h, e, d] = sum_n v[h, e, n] * k_sm[h, d, n]
    ctx = jnp.einsum('hen,hdn->hed',
                     v.astype(jnp.bfloat16), k_sm.astype(jnp.bfloat16),
                     preferred_element_type=jnp.float32)          # (H, E, D)
    # o[h, e, n] = sum_d ctx[h, e, d] * q[h, d, n]
    o = jnp.einsum('hed,hdn->hen',
                   ctx.astype(jnp.bfloat16), q.astype(jnp.bfloat16),
                   preferred_element_type=jnp.float32)            # (H, E, N)

    attn = o.reshape(heads * dim_head, n)             # (HD, N), channel = h*D + e

    # to_out: 1x1 conv with bias.
    y = jnp.dot(wout_ref[...], attn.astype(jnp.bfloat16),
                preferred_element_type=jnp.float32)   # (C, N)
    y = y + bout_ref[...]                             # bias broadcast over lanes

    # Single full-tile, lane-dense store (N is a multiple of 128).
    out_ref[0] = y.astype(out_ref.dtype)


def linear_attention(x, w_qkv, w_out, b_out, *, heads, dim_head):
    """x: (B, C, H, W); w_qkv: (3*heads*dim_head, C); w_out: (C, heads*dim_head);
    b_out: (C,). Returns (B, C, H, W) float32."""
    b, c, hh, ww = x.shape
    n = hh * ww
    hd = heads * dim_head
    assert w_qkv.shape == (3 * hd, c)
    assert w_out.shape == (c, hd)
    assert b_out.shape == (c,)

    # Matmul operands in bf16 (native MXU rate on all generations); bias,
    # output and all in-kernel softmax math stay f32.
    x_flat = x.reshape(b, c, n).astype(jnp.bfloat16)
    w_qkv_t = jnp.transpose(w_qkv).astype(jnp.bfloat16)   # (C, 3HD) lane-dense
    w_out_b = w_out.astype(jnp.bfloat16)                  # (C, HD)  lane-dense
    b_out2d = b_out.astype(jnp.float32).reshape(c, 1)

    kernel = functools.partial(_linear_attention_kernel,
                               heads=heads, dim_head=dim_head)

    out = pl.pallas_call(
        kernel,
        out_shape=jax.ShapeDtypeStruct((b, c, n), jnp.float32),
        grid_spec=pl.GridSpec(
            grid=(b,),                                  # batches independent
            in_specs=[
                pl.BlockSpec((1, c, n), lambda i: (i, 0, 0)),
                pl.BlockSpec((c, 3 * hd), lambda i: (0, 0)),
                pl.BlockSpec((c, hd), lambda i: (0, 0)),
                pl.BlockSpec((c, 1), lambda i: (0, 0)),
            ],
            out_specs=pl.BlockSpec((1, c, n), lambda i: (i, 0, 0)),
        ),
        compiler_params=pltpu.CompilerParams(
            # "parallel": with B=2 both v7x TensorCores get a batch each;
            # on single-TC v5e/v6e the two small steps run back-to-back.
            dimension_semantics=("parallel",),
            vmem_limit_bytes=32 * 1024 * 1024,
        ),
    )(x_flat, w_qkv_t, w_out_b, b_out2d)

    return out.reshape(b, c, hh, ww)


def _reference(x, w_qkv, w_out, b_out, *, heads, dim_head):
    b, c, hh, ww = x.shape
    n = hh * ww
    hd = heads * dim_head
    x_f = x.astype(jnp.float32).reshape(b, c, n)
    qkv = jnp.einsum('oc,bcn->bon', w_qkv, x_f)              # (b, 3*hd, n)
    qkv = qkv.reshape(b, 3, heads, dim_head, n)
    q, k, v = qkv[:, 0], qkv[:, 1], qkv[:, 2]                # (b, h, d, n)
    k = jax.nn.softmax(k, axis=-1)
    ctx = jnp.einsum('bhdn,bhen->bhde', k, v)
    out = jnp.einsum('bhde,bhdn->bhen', ctx, q)              # (b, h, e, n)
    out = out.reshape(b, hd, n)
    y = jnp.einsum('oc,bcn->bon', w_out, out) + b_out[None, :, None]
    return y.reshape(b, c, hh, ww)


if __name__ == "__main__":
    key = jax.random.PRNGKey(0)
    B, C, H, W = 2, 8, 16, 16
    heads, dim_head = 4, 32
    hd = heads * dim_head

    k1, k2, k3, k4 = jax.random.split(key, 4)
    x = jax.random.normal(k1, (B, C, H, W), dtype=jnp.float32)
    w_qkv = jax.random.normal(k2, (3 * hd, C), dtype=jnp.float32) * 0.1
    w_out = jax.random.normal(k3, (C, hd), dtype=jnp.float32) * 0.1
    b_out = jax.random.normal(k4, (C,), dtype=jnp.float32) * 0.1

    out = linear_attention(x, w_qkv, w_out, b_out, heads=heads, dim_head=dim_head)
    out = jax.block_until_ready(out)

    ref = _reference(x, w_qkv, w_out, b_out, heads=heads, dim_head=dim_head)
    assert out.shape == (B, C, H, W)
    # bf16 matmul operands (f32 accumulate) + approx reciprocal -> relaxed
    # tolerance vs the all-f32 reference.
    assert jnp.allclose(out, ref, atol=1e-2, rtol=1e-2), float(
        jnp.max(jnp.abs(out - ref)))

    print("KERNEL_OK")
</pallas_src>

<mosaic_0001>
module attributes {stable_mosaic.version = 11 : i64} {
  func.func @_linear_attention_kernel(%arg0: i32, %arg1: memref<1x8x256xbf16, #tpu.memory_space<vmem>>, %arg2: memref<8x384xbf16, #tpu.memory_space<vmem>>, %arg3: memref<8x128xbf16, #tpu.memory_space<vmem>>, %arg4: memref<8x1xf32, #tpu.memory_space<vmem>>, %arg5: memref<1x8x256xf32, #tpu.memory_space<vmem>>) attributes {dimension_semantics = [#tpu.dimension_semantics<parallel>], iteration_bounds = array<i64: 2>, scalar_prefetch = 0 : i64, scratch_operands = 0 : i64, tpu.core_type = #tpu.core_type<tc>, window_params = [{transform_indices = @transform_0, window_bounds = array<i64: 1, 8, 256>}, {pipeline_mode = #tpu.pipeline_mode<synchronous>, transform_indices = @transform_1, window_bounds = array<i64: 8, 384>}, {pipeline_mode = #tpu.pipeline_mode<synchronous>, transform_indices = @transform_2, window_bounds = array<i64: 8, 128>}, {pipeline_mode = #tpu.pipeline_mode<synchronous>, transform_indices = @transform_3, window_bounds = array<i64: 8, 1>}, {transform_indices = @transform_4, window_bounds = array<i64: 1, 8, 256>}]} {
    %c0 = arith.constant 0 : index
    %c0_0 = arith.constant 0 : index
    %c0_1 = arith.constant 0 : index
    %0 = vector.load %arg1[%c0, %c0_0, %c0_1] : memref<1x8x256xbf16, #tpu.memory_space<vmem>>, vector<1x8x256xbf16>
    %1 = vector.shape_cast %0 : vector<1x8x256xbf16> to vector<8x256xbf16>
    %c0_2 = arith.constant 0 : index
    %c0_3 = arith.constant 0 : index
    %2 = vector.load %arg2[%c0_2, %c0_3] : memref<8x384xbf16, #tpu.memory_space<vmem>>, vector<8x384xbf16>
    %cst = arith.constant dense<0.000000e+00> : vector<384x256xf32>
    %3 = tpu.matmul %2, %1, %cst {dimension_numbers = #tpu.dot_dimension_numbers<[0], [0], [1], [1], [0, 1, 1, 1], [], []>} : vector<8x384xbf16>, vector<8x256xbf16>, vector<384x256xf32> -> vector<384x256xf32>
    %4 = vector.shape_cast %3 : vector<384x256xf32> to vector<3x4x32x256xf32>
    %5 = vector.extract_strided_slice %4 {offsets = [0, 0, 0, 0], sizes = [1, 4, 32, 256], strides = [1, 1, 1, 1]} : vector<3x4x32x256xf32> to vector<1x4x32x256xf32>
    %6 = vector.shape_cast %5 : vector<1x4x32x256xf32> to vector<4x32x256xf32>
    %7 = vector.extract_strided_slice %4 {offsets = [1, 0, 0, 0], sizes = [1, 4, 32, 256], strides = [1, 1, 1, 1]} : vector<3x4x32x256xf32> to vector<1x4x32x256xf32>
    %8 = vector.shape_cast %7 : vector<1x4x32x256xf32> to vector<4x32x256xf32>
    %9 = vector.extract_strided_slice %4 {offsets = [2, 0, 0, 0], sizes = [1, 4, 32, 256], strides = [1, 1, 1, 1]} : vector<3x4x32x256xf32> to vector<1x4x32x256xf32>
    %10 = vector.shape_cast %9 : vector<1x4x32x256xf32> to vector<4x32x256xf32>
    %cst_4 = arith.constant dense<0xFF800000> : vector<4x32xf32>
    %11 = vector.multi_reduction <maximumf>, %8, %cst_4 [2] : vector<4x32x256xf32> to vector<4x32xf32>
    %12 = vector.shape_cast %11 : vector<4x32xf32> to vector<4x32x1xf32>
    %13 = vector.broadcast %12 : vector<4x32x1xf32> to vector<4x32x256xf32>
    %14 = arith.subf %8, %13 : vector<4x32x256xf32>
    %15 = math.exp %14 : vector<4x32x256xf32>
    %cst_5 = arith.constant dense<0.000000e+00> : vector<4x32xf32>
    %16 = vector.multi_reduction <add>, %15, %cst_5 [2] : vector<4x32x256xf32> to vector<4x32xf32>
    %17 = vector.shape_cast %16 : vector<4x32xf32> to vector<4x32x1xf32>
    %18 = tpu.reciprocal %17 {approx = true} : vector<4x32x1xf32> -> vector<4x32x1xf32>
    %19 = vector.broadcast %18 : vector<4x32x1xf32> to vector<4x32x256xf32>
    %20 = arith.mulf %15, %19 : vector<4x32x256xf32>
    %21 = arith.truncf %10 : vector<4x32x256xf32> to vector<4x32x256xbf16>
    %22 = arith.truncf %20 : vector<4x32x256xf32> to vector<4x32x256xbf16>
    "tpu.trace_start"() <{level = 10 : i32, message = "hen,hdn->hed"}> : () -> ()
    %cst_6 = arith.constant dense<0.000000e+00> : vector<4x32x32xf32>
    %23 = tpu.matmul %21, %22, %cst_6 {dimension_numbers = #tpu.dot_dimension_numbers<[2], [2], [1], [1], [0, 0, 0, 1, 1, 1], [0], [0]>} : vector<4x32x256xbf16>, vector<4x32x256xbf16>, vector<4x32x32xf32> -> vector<4x32x32xf32>
    "tpu.trace_stop"() : () -> ()
    %24 = arith.truncf %23 : vector<4x32x32xf32> to vector<4x32x32xbf16>
    %25 = arith.truncf %6 : vector<4x32x256xf32> to vector<4x32x256xbf16>
    "tpu.trace_start"() <{level = 10 : i32, message = "hed,hdn->hen"}> : () -> ()
    %cst_7 = arith.constant dense<0.000000e+00> : vector<4x32x256xf32>
    %26 = tpu.matmul %24, %25, %cst_7 {dimension_numbers = #tpu.dot_dimension_numbers<[2], [1], [1], [2], [0, 0, 0, 1, 1, 2], [0], [0]>} : vector<4x32x32xbf16>, vector<4x32x256xbf16>, vector<4x32x256xf32> -> vector<4x32x256xf32>
    "tpu.trace_stop"() : () -> ()
    %27 = vector.shape_cast %26 : vector<4x32x256xf32> to vector<128x256xf32>
    %c0_8 = arith.constant 0 : index
    %c0_9 = arith.constant 0 : index
    %28 = vector.load %arg3[%c0_8, %c0_9] : memref<8x128xbf16, #tpu.memory_space<vmem>>, vector<8x128xbf16>
    %29 = arith.truncf %27 : vector<128x256xf32> to vector<128x256xbf16>
    %cst_10 = arith.constant dense<0.000000e+00> : vector<8x256xf32>
    %30 = tpu.matmul %28, %29, %cst_10 {dimension_numbers = #tpu.dot_dimension_numbers<[1], [0], [0], [1], [0, 0, 1, 1], [], []>} : vector<8x128xbf16>, vector<128x256xbf16>, vector<8x256xf32> -> vector<8x256xf32>
    %c0_11 = arith.constant 0 : index
    %c0_12 = arith.constant 0 : index
    %31 = vector.load %arg4[%c0_11, %c0_12] : memref<8x1xf32, #tpu.memory_space<vmem>>, vector<8x1xf32>
    %32 = vector.broadcast %31 : vector<8x1xf32> to vector<8x256xf32>
    %33 = arith.addf %30, %32 : vector<8x256xf32>
    %c0_13 = arith.constant 0 : index
    %c0_14 = arith.constant 0 : index
    %c0_15 = arith.constant 0 : index
    %34 = vector.load %arg5[%c0_13, %c0_14, %c0_15] : memref<1x8x256xf32, #tpu.memory_space<vmem>>, vector<1x8x256xf32>
    %35 = vector.shape_cast %34 : vector<1x8x256xf32> to vector<8x256xf32>
    %36 = vector.shape_cast %33 : vector<8x256xf32> to vector<1x8x256xf32>
    tpu.vector_store %arg5[%c0_13, %c0_14, %c0_15], %36 {strides = array<i32>} : memref<1x8x256xf32, #tpu.memory_space<vmem>>, vector<1x8x256xf32>,
    return
  }
  func.func @transform_0(%arg0: i32) -> (i32, i32, i32) {
    %c0_i32 = arith.constant 0 : i32
    %c0_i32_0 = arith.constant 0 : i32
    %c0_i32_1 = arith.constant 0 : i32
    return %arg0, %c0_i32, %c0_i32_0 : i32, i32, i32
  }
  func.func @transform_1(%arg0: i32) -> (i32, i32) {
    %c0_i32 = arith.constant 0 : i32
    %c0_i32_0 = arith.constant 0 : i32
    %c0_i32_1 = arith.constant 0 : i32
    return %c0_i32, %c0_i32_0 : i32, i32
  }
  func.func @transform_2(%arg0: i32) -> (i32, i32) {
    %c0_i32 = arith.constant 0 : i32
    %c0_i32_0 = arith.constant 0 : i32
    %c0_i32_1 = arith.constant 0 : i32
    return %c0_i32, %c0_i32_0 : i32, i32
  }
  func.func @transform_3(%arg0: i32) -> (i32, i32) {
    %c0_i32 = arith.constant 0 : i32
    %c0_i32_0 = arith.constant 0 : i32
    %c0_i32_1 = arith.constant 0 : i32
    return %c0_i32, %c0_i32_0 : i32, i32
  }
  func.func @transform_4(%arg0: i32) -> (i32, i32, i32) {
    %c0_i32 = arith.constant 0 : i32
    %c0_i32_0 = arith.constant 0 : i32
    %c0_i32_1 = arith.constant 0 : i32
    return %arg0, %c0_i32, %c0_i32_0 : i32, i32, i32
  }
}

</mosaic_0001>

<bundles_post_ra>
// kernel: tpu_custom_call.1
= control target key start
LH: loop header
LB: loop body
LE: loop exit
PB: predicated region body
PF: predicated region fallthrough
CT: control target
= control target key end

     0   :  { %9 = vsyncpa [#allocation3], 0  ;;  %s2643_s0 = inlined_call_operand.hbm [shape: bf16[2,8,256], index: 0, kind: input, shape index: {}]   ;;  %s2644_s1 = inlined_call_operand.hbm [shape: bf16[8,384], index: 1, kind: input, shape index: {}]   ;;  %s2645_s2 = inlined_call_operand.vmem [shape: bf16[8,128], index: 2, kind: input, shape index: {}]   ;;  %s2646_s3 = inlined_call_operand.vmem [shape: f32[8,1], index: 3, kind: input, shape index: {}]   ;;  %s2647_s4 = inlined_call_operand.hbm [shape: f32[2,8,256], index: 4, kind: output, shape index: {}]  }
   0x1   :  { %11 = vsyncpa [#allocation3 + $0x1], 0 }
   0x2   :  { %12 = vsyncpa [#allocation6], 0 }
   0x3   :  { %13 = vsyncpa [#allocation4], 0 }
   0x4   :  { %15 = vsyncpa [#allocation4 + $0x1], 0  ;;  %s2089_s15 = smov 0   ;;  %s2091_s16 = smov 0  }
   0x5   :  { %s2093_s17 = smov 0   ;;  %s2095_s18 = smov 0  }
   0x6 LB: > { %s2110_s19 = sadd.s32 4294967295, %s2060_s18   ;;  %s1690_s20 = sadd.s32 4294967294, %s2060_s18   ;;  %s2060_s18 = sphi %s2095_s18, %s2669_s18   ;;  %s2056_s17 = sphi %s2093_s17, %s2668_s17   ;;  %s2052_s16 = sphi %s2091_s16, %s2667_s16   ;;  %s2048_s15 = sphi %s2089_s15, %s2666_s15  }
   0x7   : > { %p41_p0 = scmp.ne.s32.totalorder %s2052_s16, %s2048_s15  ;;  %p42_p1 = scmp.eq.s32.totalorder %s2110_s19, 0 }
   0x8   : > { %p128_p2 = scmp.eq.s32.totalorder %s2110_s19, 1  ;;  %p134_p3 = scmp.eq.s32.totalorder %s1690_s20, 1 }
   0x9   : > { %p2119_p4 = por %p42_p1, %p41_p0  ;;  %p1691_p5 = scmp.ge.s32.totalorder %s2060_s18, 1 }
   0xa   : > { %p2124_p6 = por %p134_p3, %p41_p0  ;;  %p141_p7 = scmp.lt.s32.totalorder %s2060_s18, 3 }
   0xb   : > { %s153_s25 = sshll.u32 %s2644_s1, 4  ;;  %s2062_s27 = smov [#allocation5]   ;;  %s154_s25 = int_to_ptr.hbm [resolvable:$true] %s153_s25 }
   0xc   : > { %p2132_p8 = pnand %p1691_p5, %p141_p7  ;;  %s155_s28 = sshll.u32 %s2062_s27, 4  ;;  %s156_s28 = int_to_ptr.vmem [resolvable:$true] %s155_s28 }
   0xd   : > { %s2142_s29 = sadd.s32 1, %s2060_s18   ;;  %s28_s30 = sadd.s32 1, %s2056_s17 }
   0xe   : > { %p1782_p10 = pneg %p2132_p8  ;;  %s25_s5 = ssub.s32 %s2060_s18, %s2142_s29 }
   0xf   : > { %p26_p12 = scmp.eq.s32.totalorder %s25_s5, 0  ;;  %p35_p13 = scmp.ne.s32.totalorder %s2056_s17, %s2052_s16 }
  0x10   : > { %p1783_p11 = pnand %p1782_p10, %p42_p1  ;;  %p36_p0 = scmp.eq.s32.totalorder %s2060_s18, 0 }
  0x11   : > { %s2151_s6 = scalar_select %p26_p12, %s2056_s17, %s28_s30  }
  0x12   : > { %1785 = dma.hbm_to_vmem [thread:$0]  (!%p1783_p11), %s154_s25, 192, %s156_s28, [#allocation6]  }
  0x13   : > { %p2155_p3 = por %p128_p2, %p35_p13  ;;  %p1795_p5 = scmp.lt.s32.totalorder %s2060_s18, 2 }
  0x14   : > { %s172_s8 = sand.u32 1, %s2056_s17   ;;  %s1770_s9 = sshll.u32 %s2060_s18, 3 }
  0x15   : > { %p37_p7 = por %p36_p0, %p35_p13  ;;  %s1694_s10 = sshll.u32 %s172_s8, 3 }
  0x16   : > { %s181_s13 = scalar_lea.hbm %s2643_s0, %s1770_s9  ;;  %s176_s20 = scalar_lea.vmem [#allocation2], %s1694_s10 }
  0x17   : > { %s183_s14 = sshll.u32 %s181_s13, 4  ;;  %s185_s23 = sshll.u32 %s176_s20, 4  ;;  %s184_s14 = int_to_ptr.hbm [resolvable:$true] %s183_s14  ;;  %s186_s23 = int_to_ptr.vmem [resolvable:$true] %s185_s23 }
  0x18   : > { %p2165_p10 = pnand %p1795_p5, %p37_p7  ;;  %s173_s25 = scalar_lea.sflag [#allocation3], %s172_s8 }
  0x19   : > { %s1960_s27 = sshra.s32 %s184_s14, 4  ;;  %s1967_s9 = scalar_lea.hbm %s2643_s0, 16  ;;  %s1961_s27 = int_to_ptr.hbm [resolvable:$true] %s1960_s27 }
  0x1a   : > { %s1962_s28 = scalar_lea.hbm %s1961_s27, 8  ;;  %p1964_p11 = pneg %p2165_p10 }
  0x1b   : > { %p1963_p2 = scmp.ne.s32.totalorder %s1961_s27, %s1962_s28  ;;  %p1968_p0 = scmp.lt.s32.totalorder %s1961_s27, %s2643_s0 }
  0x1c   : > { %p1969_p5 = scmp.lt.s32.totalorder %s1967_s9, %s1962_s28 }
  0x1d   : > { %p1965_p12 = pnand %p1964_p11, %p1963_p2 }
  0x1e   : > { %p1970_p7 = por %p1969_p5, %p1968_p0 }
  0x1f   : > { %p1966_p13 = pneg %p1965_p12 }
  0x21   : > { %p1971_p9 = pnand %p1970_p7, %p1966_p13 }
  0x23   : > { %1974 = shalt.err (!%p1971_p9)
}
  0x24   : > { %1789 = dma.hbm_to_vmem [thread:$0]  (!%p2165_p10), %s184_s14, 128, %s186_s23, %s173_s25  }
  0x25   : > { %194 = sbr.rel (%p2132_p8) target bundleno = 1440 (0x5a0), region = 36 }
  0x2a   : > { %s2182_s8 = sand.u32 1, %s2052_s16  }
  0x2b   : > { %s1698_s12 = sshll.u32 %s2182_s8, 3  ;;  %s197_s13 = scalar_lea.sflag [#allocation3], %s2182_s8 }
  0x2c   : > { %s200_s20 = scalar_lea.vmem [#allocation2], %s1698_s12 }
  0x2d   : > { %2035 = dma.done.wait (%p2119_p4), %s197_s13, 128  }
  0x2e   : > { %2037 = vsyncadd (%p2119_p4), %s197_s13, 4294967168 }
  0x2f   : > { %2039 = dma.done.wait (%p42_p1), [#allocation6], 192  }
  0x30   : > { %2041 = vsyncadd (%p42_p1), [#allocation6], 4294967104  ;;  %v233_v0 = vld [vmem:[#allocation5] sm:$0xff]  ;;  %v232_v1 = vld [vmem:[%s200_s20] sm:$0xff]  ;;  %vm364_vm0 = vcmask 1043456   ;;  %vm291_vm1 = vcmask 64512  }
  0x31   : > { %v237_v2 = vunpack.c.l.b16 %v233_v0  ;;  %v238_v3 = vunpack.c.h.b16 %v233_v0  ;;  %v287_v4 = vunpack.c.l.b16 %v232_v1  ;;  %v288_v5 = vunpack.c.h.b16 %v232_v1  ;;  %s1771_s24 = sshll.u32 %s2110_s19, 4  ;;  %s1700_s25 = sshll.u32 %s2182_s8, 4 }
  0x32   : > { %vm1275_vm2 = vcmask 261120   ;;  %s1605_s30 = scalar_lea.hbm %s2647_s4, %s1771_s24  ;;  %s230_s5 = scalar_lea.vmem [#allocation7], %s1700_s25 }
  0x33   : > { %v240_v6 = vpack.c.b16 %v237_v2, %v237_v2  ;;  %v241_v7 = vpack.c.b16 %v238_v3, %v238_v3  ;;  %v289_v8 = vpack.c.b16 %v287_v4, %v287_v4  ;;  %v290_v9 = vpack.c.b16 %v288_v5, %v288_v5  ;;  %s1607_s9 = sshll.u32 %s230_s5, 4  ;;  %s1609_s10 = sshll.u32 %s1605_s30, 4  ;;  %s1608_s9 = int_to_ptr.vmem [resolvable:$true] %s1607_s9  ;;  %s1610_s10 = int_to_ptr.hbm [resolvable:$true] %s1609_s10 }
  0x34   : > { %s1594_s11 = scalar_lea.sflag [#allocation4], %s2182_s8  ;;  %s2004_s19 = sshra.s32 %s1610_s10, 4  ;;  %s2005_s19 = int_to_ptr.hbm [resolvable:$true] %s2004_s19 }
  0x35   : > { %246 = vxpose.binary.xlu0.c.b16.start.end [1/2] (short) %v241_v7, %v240_v6, 128  ;;  %v366_v10 = vsel %vm364_vm0, %v289_v8, 0  ;;  %v369_v11 = vsel %vm364_vm0, %v290_v9, 0  ;;  %s2006_s12 = scalar_lea.hbm %s2005_s19, 16  ;;  %s2010_s21 = scalar_lea.hbm %s2647_s4, 32 }
  0x36   : > { %378 = vmatpush.bf16.msra.mxu0 %v366_v10  ;;  %507 = vmatpush.bf16.msra.mxu1 %v369_v11  ;;  %p2007_p1 = scmp.ne.s32.totalorder %s2005_s19, %s2006_s12  ;;  %p2011_p9 = scmp.lt.s32.totalorder %s2005_s19, %s2647_s4 }
  0x37   : > { %1772 = vmatpush.bf16.msra.mxu2 %v366_v10  ;;  %1773 = vmatpush.bf16.msra.mxu3 %v369_v11  ;;  %p2012_p10 = scmp.lt.s32.totalorder %s2010_s21, %s2006_s12 }
  0x38   : > { %p2008_p4 = pnand %p2007_p1, %p2155_p3 }
  0x39   : > { %p2013_p2 = por %p2012_p10, %p2011_p9 }
  0x3a   : > { %p2009_p8 = pneg %p2008_p4 }
  0x3c   : > { %p2014_p11 = pnand %p2013_p2, %p2009_p8 }
  0xe1   : > { %v254_v12 = vpop.trf.xlu0 }
  0xe2   : > { %1701 = vmatmul.msk.bf16.vlgmr.msra.gmra.mxu0 %vm291_vm1, %v254_v12  ;;  %1725 = vmatmul.msk.bf16.vlgmr.msra.gmra.mxu1 %vm291_vm1, %v254_v12 }
  0xe9   : > { %v255_v13 = vpop.trf.xlu0 }
  0xf1   : > { %v256_v14 = vpop.trf.xlu0 }
  0xf2   : > { %1702 = vmatmul.msk.bf16.gmra.mxu0 %vm291_vm1, %v256_v14  ;;  %1726 = vmatmul.msk.bf16.gmra.mxu1 %vm291_vm1, %v256_v14 }
  0xf9   : > { %v257_v15 = vpop.trf.xlu0 }
 0x101   : > { %v258_v16 = vpop.trf.xlu0 }
 0x102   : > { %1703 = vmatmul.msk.bf16.gmra.mxu0 %vm291_vm1, %v258_v16  ;;  %1727 = vmatmul.msk.bf16.gmra.mxu1 %vm291_vm1, %v258_v16 }
 0x109   : > { %v259_v17 = vpop.trf.xlu0 }
 0x111   : > { %v260_v18 = vpop.trf.xlu0 }
 0x112   : > { %1704 = vmatmul.msk.bf16.gmra.mxu0 %vm291_vm1, %v260_v18  ;;  %1728 = vmatmul.msk.bf16.gmra.mxu1 %vm291_vm1, %v260_v18 }
 0x119   : > { %v261_v19 = vpop.trf.xlu0 }
 0x121   : > { %v262_v20 = vpop.trf.xlu0 }
 0x122   : > { %1705 = vmatmul.msk.bf16.gmra.mxu0 %vm291_vm1, %v262_v20  ;;  %1729 = vmatmul.msk.bf16.gmra.mxu1 %vm291_vm1, %v262_v20 }
 0x129   : > { %v2204_v21 = vpop.trf.xlu0 }
 0x131   : > { %v264_v22 = vpop.trf.xlu0 }
 0x132   : > { %1706 = vmatmul.msk.bf16.gmra.mxu0 %vm291_vm1, %v264_v22  ;;  %1730 = vmatmul.msk.bf16.gmra.mxu1 %vm291_vm1, %v264_v22 }
 0x139   : > { %v2208_v23 = vpop.trf.xlu0 }
 0x141   : > { %v266_v24 = vpop.trf.xlu0 }
 0x142   : > { %1707 = vmatmul.msk.bf16.gmra.mxu0 %vm291_vm1, %v266_v24  ;;  %1731 = vmatmul.msk.bf16.gmra.mxu1 %vm291_vm1, %v266_v24 }
 0x149   : > { %v2212_v25 = vpop.trf.xlu0 }
 0x151   : > { %v268_v26 = vpop.trf.xlu0 }
 0x152   : > { %1708 = vmatmul.msk.bf16.gmra.mxu0 %vm291_vm1, %v268_v26  ;;  %1732 = vmatmul.msk.bf16.gmra.mxu1 %vm291_vm1, %v268_v26 }
 0x15f   : > { %v380_v27 = vpop.f32.mrf.mxu0  ;;  %v509_v28 = vpop.f32.mrf.mxu1 }
 0x160   : > { %v1229_v29 = vpack.c.bf16 %v509_v28, %v380_v27 }
 0x162   : > { %1709 = vmatmul.msk.bf16.gmra.mxu0 %vm291_vm1, %v255_v13  ;;  %1733 = vmatmul.msk.bf16.gmra.mxu1 %vm291_vm1, %v255_v13  ;;  %v1259_v33 = vunpack.c.l.b16 %v1229_v29  ;;  %v1260_v34 = vunpack.c.h.b16 %v1229_v29 }
 0x167   : > { %v382_v30 = vpop.f32.mrf.mxu0  ;;  %v511_v31 = vpop.f32.mrf.mxu1 }
 0x168   : > { %v1230_v32 = vpack.c.bf16 %v511_v31, %v382_v30  ;;  %v234_v30 = vld [vmem:[#allocation5 + $0x8] sm:$0xf] }
 0x169   : > { %v239_v31 = vunpack.c.l.b16 %v234_v30 }
 0x16a   : > { %v1261_v35 = vunpack.c.l.b16 %v1230_v32  ;;  %v1262_v36 = vunpack.c.h.b16 %v1230_v32 }
 0x16c   : > { %v2218_v37 = vpack.c.b16 %v1261_v35, %v1259_v33  ;;  %v2220_v38 = vpack.c.b16 %v1262_v36, %v1260_v34  ;;  %v242_v34 = vpack.c.b16 %v239_v31, %v239_v31 }
 0x16e   : > { %270 = vxpose.xlu0.c.b16.start.end [1/1] (short) %v242_v34, 128 }
 0x16f   : > { %v385_v39 = vpop.f32.mrf.mxu0  ;;  %v514_v40 = vpop.f32.mrf.mxu1 }
 0x170   : > { %v1231_v41 = vpack.c.bf16 %v514_v40, %v385_v39 }
 0x172   : > { %1710 = vmatmul.msk.bf16.gmra.mxu0 %vm291_vm1, %v257_v15  ;;  %1734 = vmatmul.msk.bf16.gmra.mxu1 %vm291_vm1, %v257_v15  ;;  %v1263_v45 = vunpack.c.l.b16 %v1231_v41  ;;  %v1264_v46 = vunpack.c.h.b16 %v1231_v41  ;;  %v269_v41 = vpop.trf.xlu0 }
 0x177   : > { %v387_v42 = vpop.f32.mrf.mxu0  ;;  %v516_v43 = vpop.f32.mrf.mxu1 }
 0x178   : > { %v1232_v44 = vpack.c.bf16 %v516_v43, %v387_v42 }
 0x17a   : > { %v1265_v47 = vunpack.c.l.b16 %v1232_v44  ;;  %v1266_v48 = vunpack.c.h.b16 %v1232_v44 }
 0x17c   : > { %v2224_v49 = vpack.c.b16 %v1265_v47, %v1263_v45  ;;  %v2226_v50 = vpack.c.b16 %v1266_v48, %v1264_v46 }
 0x17f   : > { %v390_v51 = vpop.f32.mrf.mxu0  ;;  %v519_v52 = vpop.f32.mrf.mxu1 }
 0x180   : > { %v1233_v53 = vpack.c.bf16 %v519_v52, %v390_v51 }
 0x182   : > { %1711 = vmatmul.msk.bf16.gmra.mxu0 %vm291_vm1, %v259_v17  ;;  %1735 = vmatmul.msk.bf16.gmra.mxu1 %vm291_vm1, %v259_v17  ;;  %v1334_v57 = vunpack.c.l.b16 %v1233_v53  ;;  %v1335_v58 = vunpack.c.h.b16 %v1233_v53 }
 0x187   : > { %v392_v54 = vpop.f32.mrf.mxu0  ;;  %v521_v55 = vpop.f32.mrf.mxu1 }
 0x188   : > { %v1234_v56 = vpack.c.bf16 %v521_v55, %v392_v54 }
 0x18a   : > { %v1336_v59 = vunpack.c.l.b16 %v1234_v56  ;;  %v1337_v60 = vunpack.c.h.b16 %v1234_v56 }
 0x18c   : > { %v2230_v61 = vpack.c.b16 %v1336_v59, %v1334_v57  ;;  %v2232_v62 = vpack.c.b16 %v1337_v60, %v1335_v58 }
 0x18f   : > { %v395_v63 = vpop.f32.mrf.mxu0  ;;  %v524_v0 = vpop.f32.mrf.mxu1 }
 0x190   : > { %v2234_v1 = vpack.c.bf16 %v524_v0, %v395_v63 }
 0x192   : > { %1712 = vmatmul.msk.bf16.gmra.mxu0 %vm291_vm1, %v261_v19  ;;  %1736 = vmatmul.msk.bf16.gmra.mxu1 %vm291_vm1, %v261_v19 }
 0x197   : > { %v2238_v2 = vpop.f32.mrf.mxu0  ;;  %v2240_v3 = vpop.f32.mrf.mxu1 }
 0x19f   : > { %v400_v4 = vpop.f32.mrf.mxu0  ;;  %v529_v5 = vpop.f32.mrf.mxu1 }
 0x1a0   : > { %v2242_v6 = vpack.c.bf16 %v529_v5, %v400_v4 }
 0x1a2   : > { %1713 = vmatmul.msk.bf16.gmra.mxu0 %vm291_vm1, %v2204_v21  ;;  %1737 = vmatmul.msk.bf16.gmra.mxu1 %vm291_vm1, %v2204_v21 }
 0x1a7   : > { %v2248_v7 = vpop.f32.mrf.mxu0  ;;  %v2250_v8 = vpop.f32.mrf.mxu1 }
 0x1af   : > { %v405_v9 = vpop.f32.mrf.mxu0  ;;  %v534_v10 = vpop.f32.mrf.mxu1 }
 0x1b0   : > { %v2252_v11 = vpack.c.bf16 %v534_v10, %v405_v9 }
 0x1b2   : > { %1714 = vmatmul.msk.bf16.gmra.mxu0 %vm291_vm1, %v2208_v23  ;;  %1738 = vmatmul.msk.bf16.gmra.mxu1 %vm291_vm1, %v2208_v23 }
 0x1b7   : > { %v2258_v12 = vpop.f32.mrf.mxu0  ;;  %v2260_v13 = vpop.f32.mrf.mxu1 }
 0x1bf   : > { %v410_v14 = vpop.f32.mrf.mxu0  ;;  %v539_v15 = vpop.f32.mrf.mxu1 }
 0x1c0   : > { %v2262_v16 = vpack.c.bf16 %v539_v15, %v410_v14 }
 0x1c2   : > { %2655 = vst [vmem:[#allocation11_spill] sm:$0xff] %v2262_v16  ;;  %1715 = vmatmul.msk.bf16.gmra.mxu0 %vm291_vm1, %v2212_v25  ;;  %1739 = vmatmul.msk.bf16.gmra.mxu1 %vm291_vm1, %v2212_v25 }
 0x1c7   : > { %v2268_v17 = vpop.f32.mrf.mxu0  ;;  %v2270_v18 = vpop.f32.mrf.mxu1 }
 0x1c8   : > { %2656 = vst [vmem:[#allocation12_spill] sm:$0xff] %v2268_v17 }
 0x1c9   : > { %2657 = vst [vmem:[#allocation13_spill] sm:$0xff] %v2270_v18 }
 0x1cf   : > { %v415_v19 = vpop.f32.mrf.mxu0  ;;  %v544_v20 = vpop.f32.mrf.mxu1 }
 0x1d0   : > { %v2272_v21 = vpack.c.bf16 %v544_v20, %v415_v19 }
 0x1d2   : > { %2658 = vst [vmem:[#allocation14_spill] sm:$0xff] %v2272_v21  ;;  %1716 = vmatmul.msk.bf16.gmra.mxu0 %vm291_vm1, %v269_v41  ;;  %1740 = vmatmul.msk.bf16.gmra.mxu1 %vm291_vm1, %v269_v41 }
 0x1d7   : > { %v2274_v22 = vpop.f32.mrf.mxu0  ;;  %v2276_v23 = vpop.f32.mrf.mxu1 }
 0x1d8   : > { %2659 = vst [vmem:[#allocation15_spill] sm:$0xff] %v2276_v23 }
 0x1df   : > { %v420_v24 = vpop.f32.mrf.mxu0  ;;  %v549_v26 = vpop.f32.mrf.mxu1 }
 0x1e0   : > { %v629_v27 = vmax.f32 %v420_v24, %v549_v26 }
 0x1e2   : > { %630 = vmax.xlane.f32.xlu2 %v629_v27 }
 0x1e7   : > { %v2278_v28 = vpop.f32.mrf.mxu0  ;;  %v2280_v29 = vpop.f32.mrf.mxu1 }
 0x1e8   : > { %v632_v25 = vmax.f32 %v2278_v28, %v2280_v29 }
 0x1ea   : > { %633 = vmax.xlane.f32.xlu2 %v632_v25 }
 0x1ef   : > { %v425_v32 = vpop.f32.mrf.mxu0  ;;  %v554_v33 = vpop.f32.mrf.mxu1 }
 0x1f0   : > { %v635_v35 = vmax.f32 %v425_v32, %v554_v33 }
 0x1f2   : > { %636 = vmax.xlane.f32.xlu1 %v635_v35 }
 0x1f7   : > { %v427_v36 = vpop.f32.mrf.mxu0  ;;  %v556_v39 = vpop.f32.mrf.mxu1 }
 0x1f8   : > { %v638_v40 = vmax.f32 %v427_v36, %v556_v39 }
 0x1fa   : > { %639 = vmax.xlane.f32.xlu1 %v638_v40 }
 0x1ff   : > { %v2286_v42 = vpop.f32.mrf.mxu0  ;;  %v2288_v43 = vpop.f32.mrf.mxu1 }
 0x200   : > { %v641_v53 = vmax.f32 %v2286_v42, %v2288_v43 }
 0x207   : > { %v2290_v44 = vpop.f32.mrf.mxu0  ;;  %v2292_v45 = vpop.f32.mrf.mxu1 }
 0x208   : > { %v644_v55 = vmax.f32 %v2290_v44, %v2292_v45 }
 0x20f   : > { %v2294_v46 = vpop.f32.mrf.mxu0  ;;  %v2296_v47 = vpop.f32.mrf.mxu1 }
 0x210   : > { %v647_v48 = vmax.f32 %v2294_v46, %v2296_v47 }
 0x212   : > { %648 = vmax.xlane.f32.xlu1 %v647_v48 }
 0x217   : > { %v2300_v51 = vpop.f32.mrf.mxu0  ;;  %v2302_v52 = vpop.f32.mrf.mxu1 }
 0x218   : > { %v650_v54 = vmax.f32 %v2300_v51, %v2302_v52 }
 0x21a   : > { %642 = vmax.xlane.f32.xlu1 %v641_v53  ;;  %651 = vmax.xlane.f32.xlu2 %v650_v54 }
 0x21f   : > { %v2310_v57 = vpop.f32.mrf.mxu0  ;;  %v2312_v58 = vpop.f32.mrf.mxu1 }
 0x222   : > { %645 = vmax.xlane.f32.xlu2 %v644_v55 }
 0x227   : > { %v2314_v20 = vpop.f32.mrf.mxu0  ;;  %v2316_v27 = vpop.f32.mrf.mxu1 }
 0x22f   : > { %v2332_v48 = vpop.f32.mrf.mxu0  ;;  %v2334_v53 = vpop.f32.mrf.mxu1 }
 0x255   : > { %v631_v56 = vpop.xlane.xlu2 %630 }
 0x256   : > { %v677_v0 = vsub.f32 %v420_v24, %v631_v56  ;;  %v678_v9 = vsub.f32 %v549_v26, %v631_v56 }
 0x258   : > { %v709_v10 = vmul.f32 1.442695, %v677_v0  ;;  %v711_v14 = vmul.f32 1.442695, %v678_v9 }
 0x25d   : > { %v634_v15 = vpop.xlane.xlu2 %633 }
 0x25e   : > { %v679_v24 = vsub.f32 %v2278_v28, %v634_v15  ;;  %v680_v34 = vsub.f32 %v2280_v29, %v634_v15 }
 0x260   : > { %v713_v40 = vmul.f32 1.442695, %v679_v24 }
 0x265   : > { %v637_v59 = vpop.xlane.xlu1 %636 }
 0x266   : > { %v681_v60 = vsub.f32 %v425_v32, %v637_v59  ;;  %v682_v63 = vsub.f32 %v554_v33, %v637_v59 }
 0x268   : > { %v717_v4 = vmul.f32 1.442695, %v681_v60  ;;  %v719_v5 = vmul.f32 1.442695, %v682_v63  ;;  %v2346_v60 = vpop.f32.mrf.mxu0  ;;  %v2348_v63 = vpop.f32.mrf.mxu1 }
 0x26a   : > { %1834 = vpow2.f32 %v717_v4  ;;  %v659_v4 = vmax.f32 %v2332_v48, %v2334_v53 }
 0x26b   : > { %1836 = vpow2.f32 %v719_v5 }
 0x26c   : > { %1838 = vpow2.f32 %v709_v10 }
 0x26d   : > { %v640_v19 = vpop.xlane.xlu1 %639  ;;  %1840 = vpow2.f32 %v711_v14 }
 0x26e   : > { %v683_v25 = vsub.f32 %v427_v36, %v640_v19  ;;  %v684_v30 = vsub.f32 %v556_v39, %v640_v19  ;;  %v715_v36 = vmul.f32 1.442695, %v680_v34  ;;  %v653_v19 = vmax.f32 %v2310_v57, %v2312_v58 }
 0x270   : > { %v2318_v31 = vpop.eup %1834  ;;  %v721_v32 = vmul.f32 1.442695, %v683_v25  ;;  %v723_v33 = vmul.f32 1.442695, %v684_v30  ;;  %v662_v25 = vmax.f32 %v2346_v60, %v2348_v63  ;;  %v2360_v30 = vpop.f32.mrf.mxu0 }
 0x271   : > { %v2321_v26 = vpop.eup %1836  ;;  %v2362_v24 = vpop.f32.mrf.mxu1 }
 0x272   : > { %1842 = vpow2.f32 %v721_v32  ;;  %v779_v35 = vadd.f32 %v2321_v26, %v2318_v31  ;;  %v2326_v39 = vpop.eup %1838 }
 0x273   : > { %1844 = vpow2.f32 %v723_v33  ;;  %v2328_v41 = vpop.eup %1840 }
 0x274   : > { %780 = vadd.xlane.f32.xlu1 %v779_v35  ;;  %1846 = vpow2.f32 %v713_v40  ;;  %v773_v54 = vadd.f32 %v2328_v41, %v2326_v39 }
 0x275   : > { %1848 = vpow2.f32 %v715_v36 }
 0x278   : > { %v2330_v28 = vpop.eup %1842 }
 0x279   : > { %v2336_v29 = vpop.eup %1844 }
 0x27a   : > { %v782_v55 = vadd.f32 %v2336_v29, %v2330_v28  ;;  %v2342_v56 = vpop.eup %1846 }
 0x27b   : > { %v2344_v59 = vpop.eup %1848 }
 0x27c   : > { %774 = vadd.xlane.f32.xlu1 %v773_v54  ;;  %783 = vadd.xlane.f32.xlu2 %v782_v55  ;;  %v776_v0 = vadd.f32 %v2344_v59, %v2342_v56 }
 0x284   : > { %777 = vadd.xlane.f32.xlu2 %v776_v0  ;;  %660 = vmax.xlane.f32.xlu1 %v659_v4 }
 0x285   : > { %v649_v5 = vpop.xlane.xlu1 %648 }
 0x286   : > { %v689_v9 = vsub.f32 %v2294_v46, %v649_v5  ;;  %v690_v10 = vsub.f32 %v2296_v47, %v649_v5 }
 0x288   : > { %v733_v14 = vmul.f32 1.442695, %v689_v9  ;;  %v735_v15 = vmul.f32 1.442695, %v690_v10  ;;  %v2378_v9 = vpop.f32.mrf.mxu0  ;;  %v2380_v10 = vpop.f32.mrf.mxu1 }
 0x28a   : > { %1850 = vpow2.f32 %v733_v14 }
 0x28b   : > { %1852 = vpow2.f32 %v735_v15 }
 0x28c   : > { %654 = vmax.xlane.f32.xlu1 %v653_v19  ;;  %663 = vmax.xlane.f32.xlu2 %v662_v25 }
 0x28d   : > { %v643_v32 = vpop.xlane.xlu1 %642  ;;  %v652_v46 = vpop.xlane.xlu2 %651 }
 0x28e   : > { %v685_v47 = vsub.f32 %v2286_v42, %v643_v32  ;;  %v686_v33 = vsub.f32 %v2288_v43, %v643_v32  ;;  %v691_v34 = vsub.f32 %v2300_v51, %v652_v46  ;;  %v692_v35 = vsub.f32 %v2302_v52, %v652_v46 }
 0x28f   : > { %v656_v42 = vmax.f32 %v2314_v20, %v2316_v27 }
 0x290   : > { %v2368_v40 = vpop.eup %1850  ;;  %v725_v36 = vmul.f32 1.442695, %v685_v47  ;;  %v727_v54 = vmul.f32 1.442695, %v686_v33  ;;  %v737_v55 = vmul.f32 1.442695, %v691_v34  ;;  %v2395_v33 = vpop.f32.mrf.mxu0 }
 0x291   : > { %v2370_v0 = vpop.eup %1852  ;;  %v739_v4 = vmul.f32 1.442695, %v692_v35  ;;  %v2397_v34 = vpop.f32.mrf.mxu1 }
 0x292   : > { %1854 = vpow2.f32 %v725_v36  ;;  %v791_v5 = vadd.f32 %v2370_v0, %v2368_v40  ;;  %v671_v36 = vmax.f32 %v2395_v33, %v2397_v34 }
 0x293   : > { %1856 = vpow2.f32 %v727_v54 }
 0x294   : > { %1858 = vpow2.f32 %v737_v55  ;;  %792 = vadd.xlane.f32.xlu1 %v791_v5  ;;  %657 = vmax.xlane.f32.xlu2 %v656_v42  ;;  %v665_v42 = vmax.f32 %v2360_v30, %v2362_v24 }
 0x295   : > { %1860 = vpow2.f32 %v739_v4  ;;  %v646_v43 = vpop.xlane.xlu2 %645 }
 0x296   : > { %v687_v51 = vsub.f32 %v2290_v44, %v646_v43  ;;  %v688_v52 = vsub.f32 %v2292_v45, %v646_v43  ;;  %v278_v45 = vpop.trf.xlu0 }
 0x297   : > { %1717 = vmatmul.msk.bf16.gmra.mxu0 %vm291_vm1, %v278_v45  ;;  %1741 = vmatmul.msk.bf16.gmra.mxu1 %vm291_vm1, %v278_v45 }
 0x298   : > { %v2382_v14 = vpop.eup %1854  ;;  %v729_v15 = vmul.f32 1.442695, %v687_v51  ;;  %v731_v19 = vmul.f32 1.442695, %v688_v52  ;;  %v2408_v4 = vpop.f32.mrf.mxu0  ;;  %v668_v52 = vmax.f32 %v2378_v9, %v2380_v10 }
 0x299   : > { %v2384_v25 = vpop.eup %1856  ;;  %v2410_v5 = vpop.f32.mrf.mxu1 }
 0x29a   : > { %v2386_v32 = vpop.eup %1858  ;;  %1862 = vpow2.f32 %v729_v15  ;;  %v785_v46 = vadd.f32 %v2384_v25, %v2382_v14  ;;  %v674_v43 = vmax.f32 %v2408_v4, %v2410_v5 }
 0x29b   : > { %v2390_v47 = vpop.eup %1860  ;;  %1864 = vpow2.f32 %v731_v19 }
 0x29c   : > { %786 = vadd.xlane.f32.xlu1 %v785_v46  ;;  %v794_v44 = vadd.f32 %v2390_v47, %v2386_v32 }
 0x29e   : > { %795 = vadd.xlane.f32.xlu2 %v794_v44  ;;  %v279_v51 = vpop.trf.xlu0 }
 0x2a0   : > { %v2400_v35 = vpop.eup %1862 }
 0x2a1   : > { %v2404_v54 = vpop.eup %1864 }
 0x2a2   : > { %v788_v55 = vadd.f32 %v2404_v54, %v2400_v35 }
 0x2a4   : > { %672 = vmax.xlane.f32.xlu1 %v671_v36 }
 0x2a6   : > { %789 = vadd.xlane.f32.xlu2 %v788_v55  ;;  %v280_v15 = vpop.trf.xlu0 }
 0x2a7   : > { %1718 = vmatmul.msk.bf16.gmra.mxu0 %vm291_vm1, %v279_v51  ;;  %1742 = vmatmul.msk.bf16.gmra.mxu1 %vm291_vm1, %v279_v51 }
 0x2ac   : > { %666 = vmax.xlane.f32.xlu1 %v665_v42 }
 0x2ae   : > { %675 = vmax.xlane.f32.xlu2 %v674_v43  ;;  %v281_v19 = vpop.trf.xlu0 }
 0x2b6   : > { %669 = vmax.xlane.f32.xlu2 %v668_v52  ;;  %v282_v44 = vpop.trf.xlu0 }
 0x2b7   : > { %1719 = vmatmul.msk.bf16.gmra.mxu0 %vm291_vm1, %v280_v15  ;;  %1743 = vmatmul.msk.bf16.gmra.mxu1 %vm291_vm1, %v280_v15 }
 0x2be   : > { %v283_v18 = vpop.trf.xlu0 }
 0x2bf   : > { %1722 = vmatmul.msk.bf16.vlgmr.msra.gmra.mxu2 %vm291_vm1, %v283_v18  ;;  %1746 = vmatmul.msk.bf16.vlgmr.msra.gmra.mxu3 %vm291_vm1, %v283_v18 }
 0x2c7   : > { %1720 = vmatmul.msk.bf16.gmra.mxu0 %vm291_vm1, %v281_v19  ;;  %1744 = vmatmul.msk.bf16.gmra.mxu1 %vm291_vm1, %v281_v19 }
 0x2d7   : > { %1721 = vmatmul.msk.bf16.gmra.mxu0 %vm291_vm1, %v282_v44  ;;  %1745 = vmatmul.msk.bf16.gmra.mxu1 %vm291_vm1, %v282_v44 }
 0x2e7   : > { %v781_v46 = vpop.xlane.xlu1 %780 }
 0x2e8   : > { %1866 = vrcp.f32 %v781_v46 }
 0x2ee   : > { %v1867_v55 = vpop.eup %1866 }
 0x2ef   : > { %v775_v45 = vpop.xlane.xlu1 %774  ;;  %v784_v36 = vpop.xlane.xlu2 %783  ;;  %v841_v42 = vmul.f32 %v1867_v55, %v2318_v31  ;;  %v842_v43 = vmul.f32 %v1867_v55, %v2321_v26 }
 0x2f0   : > { %1868 = vrcp.f32 %v775_v45 }
 0x2f1   : > { %1870 = vrcp.f32 %v784_v36  ;;  %v887_v16 = vpack.c.bf16 %v842_v43, %v841_v42 }
 0x2f3   : > { %v930_v43 = vunpack.c.h.b16 %v887_v16 }
 0x2f6   : > { %v1869_v51 = vpop.eup %1868 }
 0x2f7   : > { %v1871_v52 = vpop.eup %1870  ;;  %v778_v15 = vpop.xlane.xlu2 %777  ;;  %v837_v36 = vmul.f32 %v1869_v51, %v2326_v39  ;;  %v838_v55 = vmul.f32 %v1869_v51, %v2328_v41 }
 0x2f8   : > { %v661_v19 = vpop.xlane.xlu1 %660  ;;  %1872 = vrcp.f32 %v778_v15  ;;  %v843_v44 = vmul.f32 %v1871_v52, %v2330_v28  ;;  %v844_v45 = vmul.f32 %v1871_v52, %v2336_v29 }
 0x2f9   : > { %v697_v46 = vsub.f32 %v2332_v48, %v661_v19  ;;  %v698_v21 = vsub.f32 %v2334_v53, %v661_v19  ;;  %v929_v48 = vunpack.c.l.b16 %v887_v16  ;;  %v885_v19 = vpack.c.bf16 %v838_v55, %v837_v36 }
 0x2fa   : > { %v888_v42 = vpack.c.bf16 %v844_v45, %v843_v44 }
 0x2fb   : > { %v749_v31 = vmul.f32 1.442695, %v697_v46  ;;  %v751_v26 = vmul.f32 1.442695, %v698_v21  ;;  %v925_v36 = vunpack.c.l.b16 %v885_v19 }
 0x2fc   : > { %v931_v53 = vunpack.c.l.b16 %v888_v42  ;;  %v932_v28 = vunpack.c.h.b16 %v888_v42 }
 0x2fd   : > { %1874 = vpow2.f32 %v749_v31 }
 0x2fe   : > { %1876 = vpow2.f32 %v751_v26  ;;  %v1873_v15 = vpop.eup %1872  ;;  %v935_v29 = vpack.c.b16 %v931_v53, %v929_v48  ;;  %v936_v52 = vpack.c.b16 %v932_v28, %v930_v43  ;;  %v284_v43 = vpop.trf.xlu0 }
 0x2ff   : > { %v664_v23 = vpop.xlane.xlu2 %663  ;;  %v839_v18 = vmul.f32 %v1873_v15, %v2342_v56  ;;  %v840_v21 = vmul.f32 %v1873_v15, %v2344_v59  ;;  %1723 = vmatmul.msk.bf16.gmra.mxu2 %vm291_vm1, %v284_v43  ;;  %1747 = vmatmul.msk.bf16.gmra.mxu3 %vm291_vm1, %v284_v43 }
 0x300   : > { %v655_v17 = vpop.xlane.xlu1 %654  ;;  %v699_v51 = vsub.f32 %v2346_v60, %v664_v23  ;;  %v700_v46 = vsub.f32 %v2348_v63, %v664_v23  ;;  %947 = vmatpush.bf16.xpose.msrb.mxu2 %v935_v29  ;;  %966 = vmatpush.bf16.xpose.msrb.mxu3 %v936_v52 }
 0x301   : > { %v693_v39 = vsub.f32 %v2310_v57, %v655_v17  ;;  %v694_v41 = vsub.f32 %v2312_v58, %v655_v17  ;;  %v886_v16 = vpack.c.bf16 %v840_v21, %v839_v18  ;;  %v926_v57 = vunpack.c.h.b16 %v885_v19 }
 0x302   : > { %v753_v26 = vmul.f32 1.442695, %v699_v51  ;;  %v755_v59 = vmul.f32 1.442695, %v700_v46 }
 0x303   : > { %v2442_v44 = vpop.eup %1874  ;;  %v741_v45 = vmul.f32 1.442695, %v693_v39  ;;  %v743_v31 = vmul.f32 1.442695, %v694_v41  ;;  %v927_v55 = vunpack.c.l.b16 %v886_v16  ;;  %v928_v42 = vunpack.c.h.b16 %v886_v16 }
 0x304   : > { %v2444_v56 = vpop.eup %1876 }
 0x305   : > { %1878 = vpow2.f32 %v741_v45  ;;  %v803_v17 = vadd.f32 %v2444_v56, %v2442_v44  ;;  %v933_v23 = vpack.c.b16 %v927_v55, %v925_v36  ;;  %v934_v58 = vpack.c.b16 %v928_v42, %v926_v57 }
 0x306   : > { %1880 = vpow2.f32 %v743_v31 }
 0x307   : > { %1882 = vpow2.f32 %v753_v26  ;;  %804 = vadd.xlane.f32.xlu1 %v803_v17  ;;  %v658_v63 = vpop.xlane.xlu2 %657 }
 0x308   : > { %1884 = vpow2.f32 %v755_v59  ;;  %v793_v60 = vpop.xlane.xlu1 %792  ;;  %v695_v48 = vsub.f32 %v2314_v20, %v658_v63  ;;  %v696_v53 = vsub.f32 %v2316_v27, %v658_v63  ;;  %948 = vmatpush.bf16.xpose.msrb.mxu2 %v933_v23  ;;  %967 = vmatpush.bf16.xpose.msrb.mxu3 %v934_v58  ;;  %v285_v59 = vpop.trf.xlu0 }
 0x309   : > { %1886 = vrcp.f32 %v793_v60 }
 0x30a   : > { %v745_v15 = vmul.f32 1.442695, %v695_v48  ;;  %v747_v19 = vmul.f32 1.442695, %v696_v53 }
 0x30b   : > { %v2450_v28 = vpop.eup %1878 }
 0x30c   : > { %v2454_v29 = vpop.eup %1880  ;;  %1888 = vpow2.f32 %v745_v15 }
 0x30d   : > { %v2456_v52 = vpop.eup %1882  ;;  %v797_v20 = vadd.f32 %v2454_v29, %v2450_v28  ;;  %1890 = vpow2.f32 %v747_v19 }
 0x30e   : > { %v2460_v27 = vpop.eup %1884 }
 0x30f   : > { %798 = vadd.xlane.f32.xlu1 %v797_v20  ;;  %v806_v18 = vadd.f32 %v2460_v27, %v2456_v52  ;;  %v1887_v39 = vpop.eup %1886  ;;  %1724 = vmatmul.msk.bf16.gmra.mxu2 %vm291_vm1, %v285_v59 }
 0x310   : > { %v787_v21 = vpop.xlane.xlu1 %786  ;;  %v849_v16 = vmul.f32 %v1887_v39, %v2368_v40  ;;  %v850_v45 = vmul.f32 %v1887_v39, %v2370_v0  ;;  %1748 = vmatmul.msk.bf16.gmra.mxu3 %vm291_vm1, %v285_v59 }
 0x311   : > { %807 = vadd.xlane.f32.xlu2 %v806_v18  ;;  %1892 = vrcp.f32 %v787_v21  ;;  %v796_v41 = vpop.xlane.xlu2 %795 }
 0x312   : > { %v2464_v51 = vpop.eup %1888  ;;  %1894 = vrcp.f32 %v796_v41  ;;  %v891_v57 = vpack.c.bf16 %v850_v45, %v849_v16 }
 0x313   : > { %v2466_v46 = vpop.eup %1890 }
 0x314   : > { %v800_v31 = vadd.f32 %v2466_v46, %v2464_v51  ;;  %v589_v43 = vpop.f32.mrf.mxu1 }
 0x317   : > { %v1893_v26 = vpop.eup %1892 }
 0x318   : > { %v673_v36 = vpop.xlane.xlu1 %672  ;;  %v1895_v55 = vpop.eup %1894  ;;  %v845_v63 = vmul.f32 %v1893_v26, %v2382_v14  ;;  %v846_v48 = vmul.f32 %v1893_v26, %v2384_v25 }
 0x319   : > { %801 = vadd.xlane.f32.xlu2 %v800_v31  ;;  %v705_v42 = vsub.f32 %v2395_v33, %v673_v36  ;;  %v706_v17 = vsub.f32 %v2397_v34, %v673_v36  ;;  %v851_v23 = vmul.f32 %v1895_v55, %v2386_v32  ;;  %v852_v58 = vmul.f32 %v1895_v55, %v2390_v47  ;;  %v790_v40 = vpop.xlane.xlu2 %789  ;;  %v460_v33 = vpop.f32.mrf.mxu0 }
 0x31a   : > { %1896 = vrcp.f32 %v790_v40  ;;  %v1007_v34 = vunpack.c.l.b16 %v891_v57  ;;  %v1008_v47 = vunpack.c.h.b16 %v891_v57  ;;  %v889_v21 = vpack.c.bf16 %v846_v48, %v845_v63 }
 0x31b   : > { %v765_v0 = vmul.f32 1.442695, %v705_v42  ;;  %v767_v60 = vmul.f32 1.442695, %v706_v17  ;;  %v892_v53 = vpack.c.bf16 %v852_v58, %v851_v23  ;;  %v869_v39 = vpack.c.bf16 %v589_v43, %v460_v33 }
 0x31c   : > { %v1003_v17 = vunpack.c.l.b16 %v889_v21 }
 0x31d   : > { %1898 = vpow2.f32 %v765_v0  ;;  %v1009_v32 = vunpack.c.l.b16 %v892_v53  ;;  %v1010_v15 = vunpack.c.h.b16 %v892_v53  ;;  %v905_v23 = vunpack.c.l.b16 %v869_v39  ;;  %v591_v0 = vpop.f32.mrf.mxu1 }
 0x31e   : > { %1900 = vpow2.f32 %v767_v60 }
 0x31f   : > { %v1013_v19 = vpack.c.b16 %v1009_v32, %v1007_v34  ;;  %v1014_v20 = vpack.c.b16 %v1010_v15, %v1008_v47 }
 0x320   : > { %v667_v18 = vpop.xlane.xlu1 %666  ;;  %v1897_v41 = vpop.eup %1896 }
 0x321   : > { %v701_v16 = vsub.f32 %v2360_v30, %v667_v18  ;;  %v702_v14 = vsub.f32 %v2362_v24, %v667_v18  ;;  %v847_v25 = vmul.f32 %v1897_v41, %v2400_v35  ;;  %v848_v45 = vmul.f32 %v1897_v41, %v2404_v54  ;;  %1025 = vmatpush.bf16.xpose.msra.mxu2 %v1013_v19  ;;  %v676_v31 = vpop.xlane.xlu2 %675  ;;  %v462_v35 = vpop.f32.mrf.mxu0 }
 0x322   : > { %1044 = vmatpush.bf16.xpose.msra.mxu3 %v1014_v20  ;;  %v707_v55 = vsub.f32 %v2408_v4, %v676_v31  ;;  %v708_v57 = vsub.f32 %v2410_v5, %v676_v31  ;;  %v1004_v24 = vunpack.c.h.b16 %v889_v21  ;;  %v870_v4 = vpack.c.bf16 %v591_v0, %v462_v35 }
 0x323   : > { %v2484_v26 = vpop.eup %1898  ;;  %v757_v36 = vmul.f32 1.442695, %v701_v16  ;;  %v759_v59 = vmul.f32 1.442695, %v702_v14  ;;  %v890_v30 = vpack.c.bf16 %v848_v45, %v847_v25  ;;  %v906_v5 = vunpack.c.h.b16 %v869_v39 }
 0x324   : > { %v2488_v42 = vpop.eup %1900  ;;  %v769_v54 = vmul.f32 1.442695, %v707_v55  ;;  %v771_v58 = vmul.f32 1.442695, %v708_v57  ;;  %v907_v33 = vunpack.c.l.b16 %v870_v4  ;;  %v908_v34 = vunpack.c.h.b16 %v870_v4 }
 0x325   : > { %1902 = vpow2.f32 %v757_v36  ;;  %v815_v40 = vadd.f32 %v2488_v42, %v2484_v26  ;;  %v1005_v60 = vunpack.c.l.b16 %v890_v30  ;;  %v1006_v63 = vunpack.c.h.b16 %v890_v30  ;;  %v594_v25 = vpop.f32.mrf.mxu1 }
 0x326   : > { %1904 = vpow2.f32 %v759_v59  ;;  %v913_v32 = vpack.c.b16 %v907_v33, %v905_v23  ;;  %v914_v20 = vpack.c.b16 %v908_v34, %v906_v5 }
 0x327   : > { %1906 = vpow2.f32 %v769_v54  ;;  %816 = vadd.xlane.f32.xlu1 %v815_v40  ;;  %v1011_v48 = vpack.c.b16 %v1005_v60, %v1003_v17  ;;  %v1012_v53 = vpack.c.b16 %v1006_v63, %v1004_v24 }
 0x328   : > { %1908 = vpow2.f32 %v771_v58  ;;  %949 = vmatmul.bf16.vlgmr.msrb.gmra.mxu2 %v913_v32  ;;  %968 = vmatmul.bf16.vlgmr.msrb.gmra.mxu3 %v914_v20 }
 0x329   : > { %1026 = vmatpush.bf16.xpose.msra.mxu2 %v1011_v48  ;;  %v670_v43 = vpop.xlane.xlu2 %669  ;;  %v465_v21 = vpop.f32.mrf.mxu0 }
 0x32a   : > { %1045 = vmatpush.bf16.xpose.msra.mxu3 %v1012_v53  ;;  %v703_v15 = vsub.f32 %v2378_v9, %v670_v43  ;;  %v704_v19 = vsub.f32 %v2380_v10, %v670_v43  ;;  %v871_v10 = vpack.c.bf16 %v594_v25, %v465_v21 }
 0x32b   : > { %v2492_v47 = vpop.eup %1902 }
 0x32c   : > { %v2496_v18 = vpop.eup %1904  ;;  %v761_v41 = vmul.f32 1.442695, %v703_v15  ;;  %v763_v16 = vmul.f32 1.442695, %v704_v19  ;;  %v909_v57 = vunpack.c.l.b16 %v871_v10  ;;  %v910_v30 = vunpack.c.h.b16 %v871_v10 }
 0x32d   : > { %v2498_v39 = vpop.eup %1906  ;;  %v809_v14 = vadd.f32 %v2496_v18, %v2492_v47  ;;  %v596_v59 = vpop.f32.mrf.mxu1 }
 0x32e   : > { %v2502_v45 = vpop.eup %1908  ;;  %1910 = vpow2.f32 %v761_v41 }
 0x32f   : > { %810 = vadd.xlane.f32.xlu1 %v809_v14  ;;  %v818_v9 = vadd.f32 %v2502_v45, %v2498_v39  ;;  %1912 = vpow2.f32 %v763_v16 }
 0x331   : > { %819 = vadd.xlane.f32.xlu2 %v818_v9  ;;  %v467_v31 = vpop.f32.mrf.mxu0 }
 0x332   : > { %v872_v17 = vpack.c.bf16 %v596_v59, %v467_v31 }
 0x334   : > { %v2506_v36 = vpop.eup %1910  ;;  %v911_v23 = vunpack.c.l.b16 %v872_v17  ;;  %v912_v35 = vunpack.c.h.b16 %v872_v17 }
 0x335   : > { %v2508_v55 = vpop.eup %1912  ;;  %v599_v0 = vpop.f32.mrf.mxu1 }
 0x336   : > { %v812_v24 = vadd.f32 %v2508_v55, %v2506_v36  ;;  %v915_v54 = vpack.c.b16 %v911_v23, %v909_v57  ;;  %v916_v58 = vpack.c.b16 %v912_v35, %v910_v30 }
 0x338   : > { %954 = vmatmul.bf16.gmra.mxu2 %v915_v54  ;;  %973 = vmatmul.bf16.gmra.mxu3 %v916_v58 }
 0x339   : > { %813 = vadd.xlane.f32.xlu2 %v812_v24  ;;  %v470_v40 = vpop.f32.mrf.mxu0 }
 0x33a   : > { %v873_v60 = vpack.c.bf16 %v599_v0, %v470_v40 }
 0x33c   : > { %v983_v5 = vunpack.c.l.b16 %v873_v60  ;;  %v984_v48 = vunpack.c.h.b16 %v873_v60 }
 0x33d   : > { %v601_v4 = vpop.f32.mrf.mxu1 }
 0x341   : > { %v472_v63 = vpop.f32.mrf.mxu0 }
 0x342   : > { %v874_v53 = vpack.c.bf16 %v601_v4, %v472_v63  ;;  %v2512_v30 = vpop.f32.mrf.mxu2  ;;  %v2514_v17 = vpop.f32.mrf.mxu3 }
 0x344   : > { %v985_v33 = vunpack.c.l.b16 %v874_v53  ;;  %v986_v34 = vunpack.c.h.b16 %v874_v53 }
 0x345   : > { %v604_v15 = vpop.f32.mrf.mxu1 }
 0x346   : > { %v991_v43 = vpack.c.b16 %v985_v33, %v983_v5  ;;  %v992_v32 = vpack.c.b16 %v986_v34, %v984_v48 }
 0x348   : > { %1027 = vmatmul.bf16.vlgmr.msra.gmra.mxu2 %v991_v43  ;;  %1046 = vmatmul.bf16.vlgmr.msra.gmra.mxu3 %v992_v32 }
 0x349   : > { %v475_v19 = vpop.f32.mrf.mxu0 }
 0x34a   : > { %v875_v41 = vpack.c.bf16 %v604_v15, %v475_v19  ;;  %v2518_v40 = vpop.f32.mrf.mxu2  ;;  %v616_v0 = vpop.f32.mrf.mxu3 }
 0x34c   : > { %v987_v14 = vunpack.c.l.b16 %v875_v41  ;;  %v988_v25 = vunpack.c.h.b16 %v875_v41 }
 0x34d   : > { %v606_v20 = vpop.f32.mrf.mxu1 }
 0x351   : > { %v477_v21 = vpop.f32.mrf.mxu0 }
 0x352   : > { %v876_v16 = vpack.c.bf16 %v606_v20, %v477_v21 }
 0x354   : > { %v989_v9 = vunpack.c.l.b16 %v876_v16  ;;  %v990_v10 = vunpack.c.h.b16 %v876_v16 }
 0x355   : > { %v609_v33 = vpop.f32.mrf.mxu1 }
 0x356   : > { %v993_v31 = vpack.c.b16 %v989_v9, %v987_v14  ;;  %v994_v59 = vpack.c.b16 %v990_v10, %v988_v25 }
 0x358   : > { %1032 = vmatmul.bf16.gmra.mxu2 %v993_v31  ;;  %1051 = vmatmul.bf16.gmra.mxu3 %v994_v59 }
 0x359   : > { %v480_v4 = vpop.f32.mrf.mxu0 }
 0x35d   : > { %v611_v10 = vpop.f32.mrf.mxu1 }
 0x37a   : > { %v805_v57 = vpop.xlane.xlu1 %804 }
 0x37b   : > { %1914 = vrcp.f32 %v805_v57 }
 0x381   : > { %v1915_v24 = vpop.eup %1914 }
 0x382   : > { %v799_v23 = vpop.xlane.xlu1 %798  ;;  %v857_v54 = vmul.f32 %v1915_v24, %v2442_v44  ;;  %v858_v58 = vmul.f32 %v1915_v24, %v2444_v56  ;;  %v2526_v25 = vpop.f32.mrf.mxu2 }
 0x383   : > { %v2528_v9 = vpop.f32.mrf.mxu3 }
 0x384   : > { %v808_v35 = vpop.xlane.xlu2 %807  ;;  %v895_v63 = vpack.c.bf16 %v858_v58, %v857_v54 }
 0x385   : > { %1916 = vrcp.f32 %v808_v35 }
 0x386   : > { %1918 = vrcp.f32 %v799_v23  ;;  %v1085_v32 = vunpack.c.l.b16 %v895_v63  ;;  %v1086_v44 = vunpack.c.h.b16 %v895_v63  ;;  %v877_v23 = vpack.c.bf16 %v609_v33, %v480_v4 }
 0x38b   : > { %v1917_v60 = vpop.eup %1916 }
 0x38c   : > { %v859_v5 = vmul.f32 %v1917_v60, %v2456_v52  ;;  %v860_v48 = vmul.f32 %v1917_v60, %v2460_v27  ;;  %v802_v53 = vpop.xlane.xlu2 %801  ;;  %v1919_v34 = vpop.eup %1918  ;;  %v1062_v60 = vunpack.c.h.b16 %v877_v23 }
 0x38d   : > { %1920 = vrcp.f32 %v802_v53  ;;  %v853_v56 = vmul.f32 %v1919_v34, %v2450_v28  ;;  %v854_v15 = vmul.f32 %v1919_v34, %v2454_v29  ;;  %v482_v28 = vpop.f32.mrf.mxu0  ;;  %v621_v53 = vpop.f32.mrf.mxu3 }
 0x38e   : > { %v896_v43 = vpack.c.bf16 %v860_v48, %v859_v5  ;;  %v878_v35 = vpack.c.bf16 %v611_v10, %v482_v28  ;;  %v492_v48 = vpop.f32.mrf.mxu2 }
 0x38f   : > { %v893_v14 = vpack.c.bf16 %v854_v15, %v853_v56  ;;  %v879_v15 = vpack.c.bf16 %v2514_v17, %v2512_v30 }
 0x390   : > { %v1087_v19 = vunpack.c.l.b16 %v896_v43  ;;  %v1088_v20 = vunpack.c.h.b16 %v896_v43  ;;  %v1063_v63 = vunpack.c.l.b16 %v878_v35  ;;  %v1064_v5 = vunpack.c.h.b16 %v878_v35 }
 0x391   : > { %v1081_v29 = vunpack.c.l.b16 %v893_v14  ;;  %v1082_v57 = vunpack.c.h.b16 %v893_v14 }
 0x392   : > { %v1091_v21 = vpack.c.b16 %v1087_v19, %v1085_v32  ;;  %v1092_v41 = vpack.c.b16 %v1088_v20, %v1086_v44  ;;  %v1070_v43 = vpack.c.b16 %v1064_v5, %v1062_v60 }
 0x393   : > { %v1921_v16 = vpop.eup %1920 }
 0x394   : > { %v855_v52 = vmul.f32 %v1921_v16, %v2464_v51  ;;  %v856_v27 = vmul.f32 %v1921_v16, %v2466_v46  ;;  %1103 = vmatpush.bf16.xpose.msrb.mxu2 %v1091_v21  ;;  %1122 = vmatpush.bf16.xpose.msrb.mxu3 %v1092_v41  ;;  %v1061_v46 = vunpack.c.l.b16 %v877_v23  ;;  %v880_v21 = vpack.c.bf16 %v616_v0, %v2518_v40 }
 0x395   : > { %v2536_v20 = vpop.f32.mrf.mxu3 }
 0x396   : > { %v894_v31 = vpack.c.bf16 %v856_v27, %v855_v52  ;;  %v1069_v34 = vpack.c.b16 %v1063_v63, %v1061_v46  ;;  %v2534_v19 = vpop.f32.mrf.mxu2  ;;  %v1065_v52 = vunpack.c.l.b16 %v879_v15  ;;  %v1067_v28 = vunpack.c.l.b16 %v880_v21 }
 0x398   : > { %v1083_v59 = vunpack.c.l.b16 %v894_v31  ;;  %v1084_v24 = vunpack.c.h.b16 %v894_v31  ;;  %v1068_v31 = vunpack.c.h.b16 %v880_v21 }
 0x39a   : > { %v817_v54 = vpop.xlane.xlu1 %816  ;;  %v1089_v51 = vpack.c.b16 %v1083_v59, %v1081_v29  ;;  %v1090_v58 = vpack.c.b16 %v1084_v24, %v1082_v57  ;;  %v1071_v24 = vpack.c.b16 %v1067_v28, %v1065_v52 }
 0x39b   : > { %1922 = vrcp.f32 %v817_v54 }
 0x39c   : > { %1104 = vmatpush.bf16.xpose.msrb.mxu2 %v1089_v51  ;;  %1123 = vmatpush.bf16.xpose.msrb.mxu3 %v1090_v58 }
 0x39d   : > { %v626_v54 = vpop.f32.mrf.mxu3 }
 0x3a1   : > { %v1923_v32 = vpop.eup %1922 }
 0x3a2   : > { %v811_v44 = vpop.xlane.xlu1 %810  ;;  %v865_v33 = vmul.f32 %v1923_v32, %v2484_v26  ;;  %v866_v56 = vmul.f32 %v1923_v32, %v2488_v42  ;;  %v1066_v42 = vunpack.c.h.b16 %v879_v15  ;;  %v882_v32 = vpack.c.bf16 %v621_v53, %v492_v48 }
 0x3a3   : > { %1105 = vmatmul.bf16.vlgmr.msrb.gmra.mxu2 %v1069_v34  ;;  %1124 = vmatmul.bf16.vlgmr.msrb.gmra.mxu3 %v1070_v43  ;;  %v881_v43 = vpack.c.bf16 %v2528_v9, %v2526_v25  ;;  %v1338_v9 = vunpack.c.l.b16 %v2234_v1 }
 0x3a4   : > { %v820_v4 = vpop.xlane.xlu2 %819  ;;  %v899_v16 = vpack.c.bf16 %v866_v56, %v865_v33  ;;  %v1072_v23 = vpack.c.b16 %v1068_v31, %v1066_v42  ;;  %v1141_v21 = vunpack.c.l.b16 %v882_v32 }
 0x3a5   : > { %1924 = vrcp.f32 %v820_v4  ;;  %v1140_v15 = vunpack.c.h.b16 %v881_v43 }
 0x3a6   : > { %1926 = vrcp.f32 %v811_v44  ;;  %v1163_v17 = vunpack.c.l.b16 %v899_v16  ;;  %v1164_v29 = vunpack.c.h.b16 %v899_v16  ;;  %v1236_v44 = vpack.c.bf16 %v2240_v3, %v2238_v2 }
 0x3a7   : > { %v1339_v2 = vunpack.c.h.b16 %v2234_v1  ;;  %v883_v1 = vpack.c.bf16 %v2536_v20, %v2534_v19  ;;  %v1240_v19 = vpack.c.bf16 %v2260_v13, %v2258_v12  ;;  %v1409_v13 = vunpack.c.h.b16 %v2242_v6 }
 0x3a8   : > { %v1340_v16 = vunpack.c.l.b16 %v1236_v44  ;;  %v1341_v25 = vunpack.c.h.b16 %v1236_v44 }
 0x3aa   : > { %v1344_v53 = vpack.c.b16 %v1340_v16, %v1338_v9  ;;  %v1345_v52 = vpack.c.b16 %v1341_v25, %v1339_v2  ;;  %v2661_v25 = vld [vmem:[#allocation12_spill] sm:$0xff]  ;;  %v2662_v9 = vld [vmem:[#allocation13_spill] sm:$0xff] }
 0x3ab   : > { %v1925_v41 = vpop.eup %1924  ;;  %v969_v56 = vpop.f32.mrf.mxu3  ;;  %v1242_v2 = vpack.c.bf16 %v2662_v9, %v2661_v25 }
 0x3ac   : > { %v867_v27 = vmul.f32 %v1925_v41, %v2498_v39  ;;  %v868_v14 = vmul.f32 %v1925_v41, %v2502_v45  ;;  %v814_v26 = vpop.xlane.xlu2 %813  ;;  %v1927_v10 = vpop.eup %1926  ;;  %v1142_v41 = vunpack.c.h.b16 %v882_v32 }
 0x3ad   : > { %1928 = vrcp.f32 %v814_v26  ;;  %v861_v59 = vmul.f32 %v1927_v10, %v2492_v47  ;;  %v862_v40 = vmul.f32 %v1927_v10, %v2496_v18  ;;  %v497_v45 = vpop.f32.mrf.mxu2 }
 0x3ae   : > { %v900_v30 = vpack.c.bf16 %v868_v14, %v867_v27  ;;  %v1148_v48 = vpack.c.b16 %v1142_v41, %v1140_v15  ;;  %v884_v27 = vpack.c.bf16 %v626_v54, %v497_v45  ;;  %v1143_v14 = vunpack.c.l.b16 %v883_v1  ;;  %v2660_v15 = vld [vmem:[#allocation15_spill] sm:$0xff] }
 0x3af   : > { %v897_v47 = vpack.c.bf16 %v862_v40, %v861_v59 }
 0x3b0   : > { %v1165_v0 = vunpack.c.l.b16 %v900_v30  ;;  %v1166_v57 = vunpack.c.h.b16 %v900_v30  ;;  %v1145_v26 = vunpack.c.l.b16 %v884_v27 }
 0x3b1   : > { %v1159_v18 = vunpack.c.l.b16 %v897_v47  ;;  %v1160_v5 = vunpack.c.h.b16 %v897_v47 }
 0x3b2   : > { %v1169_v39 = vpack.c.b16 %v1165_v0, %v1163_v17  ;;  %v1170_v35 = vpack.c.b16 %v1166_v57, %v1164_v29  ;;  %v1149_v28 = vpack.c.b16 %v1145_v26, %v1143_v14  ;;  %v1238_v0 = vpack.c.bf16 %v2250_v8, %v2248_v7 }
 0x3b3   : > { %v1929_v51 = vpop.eup %1928  ;;  %1110 = vmatmul.bf16.gmra.mxu2 %v1071_v24  ;;  %1129 = vmatmul.bf16.gmra.mxu3 %v1072_v23  ;;  %v1414_v57 = vunpack.c.l.b16 %v1240_v19  ;;  %v1415_v24 = vunpack.c.h.b16 %v1240_v19  ;;  %v1408_v8 = vunpack.c.l.b16 %v2242_v6  ;;  %v1484_v14 = vunpack.c.l.b16 %v1242_v2 }
 0x3b4   : > { %v863_v58 = vmul.f32 %v1929_v51, %v2506_v36  ;;  %v864_v46 = vmul.f32 %v1929_v51, %v2508_v55  ;;  %1181 = vmatpush.bf16.xpose.msra.mxu2 %v1169_v39  ;;  %1200 = vmatpush.bf16.xpose.msra.mxu3 %v1170_v35  ;;  %v1139_v55 = vunpack.c.l.b16 %v881_v43  ;;  %v1412_v39 = vunpack.c.l.b16 %v2252_v11 }
 0x3b5   : > { %v950_v36 = vpop.f32.mrf.mxu2  ;;  %v1413_v35 = vunpack.c.h.b16 %v2252_v11  ;;  %v1410_v45 = vunpack.c.l.b16 %v1238_v0  ;;  %v1411_v54 = vunpack.c.h.b16 %v1238_v0 }
 0x3b6   : > { %v898_v60 = vpack.c.bf16 %v864_v46, %v863_v58  ;;  %v1147_v3 = vpack.c.b16 %v1141_v21, %v1139_v55  ;;  %v970_v30 = vadd.f32 %v969_v56, %v950_v36  ;;  %v1418_v51 = vpack.c.b16 %v1414_v57, %v1412_v39 }
 0x3b7   : > { %v1419_v58 = vpack.c.b16 %v1415_v24, %v1413_v35  ;;  %v1416_v11 = vpack.c.b16 %v1410_v45, %v1408_v8  ;;  %v1244_v21 = vpack.c.bf16 %v2660_v15, %v2274_v22 }
 0x3b8   : > { %v1161_v63 = vunpack.c.l.b16 %v898_v60  ;;  %v1162_v34 = vunpack.c.h.b16 %v898_v60  ;;  %v1213_v29 = vpack.c.bf16 %v970_v30, %v970_v30  ;;  %v1417_v60 = vpack.c.b16 %v1411_v54, %v1409_v13 }
 0x3ba   : > { %v1167_v4 = vpack.c.b16 %v1161_v63, %v1159_v18  ;;  %v1168_v33 = vpack.c.b16 %v1162_v34, %v1160_v5  ;;  %v1249_v20 = vunpack.c.l.b16 %v1213_v29 }
 0x3bc   : > { %1182 = vmatpush.bf16.xpose.msra.mxu2 %v1167_v4  ;;  %1201 = vmatpush.bf16.xpose.msra.mxu3 %v1168_v33 }
 0x3c3   : > { %1183 = vmatmul.bf16.vlgmr.msra.gmra.mxu2 %v1147_v3  ;;  %1202 = vmatmul.bf16.vlgmr.msra.gmra.mxu3 %v1148_v48  ;;  %v1488_v3 = vunpack.c.l.b16 %v1244_v21  ;;  %v1489_v48 = vunpack.c.h.b16 %v1244_v21 }
 0x3c4   : > { %1288 = vmatpush.bf16.msrb.mxu2 %v2224_v49  ;;  %1307 = vmatpush.bf16.msrb.mxu3 %v2226_v50  ;;  %v952_v49 = vpop.f32.mrf.mxu2  ;;  %v971_v50 = vpop.f32.mrf.mxu3 }
 0x3c5   : > { %v972_v17 = vadd.f32 %v971_v50, %v952_v49 }
 0x3c8   : > { %1289 = vmatpush.bf16.msrb.mxu2 %v2218_v37  ;;  %1308 = vmatpush.bf16.msrb.mxu3 %v2220_v38  ;;  %v1144_v37 = vunpack.c.h.b16 %v883_v1  ;;  %v1146_v38 = vunpack.c.h.b16 %v884_v27 }
 0x3ca   : > { %v1150_v31 = vpack.c.b16 %v1146_v38, %v1144_v37  ;;  %v1485_v37 = vunpack.c.h.b16 %v1242_v2 }
 0x3cc   : > { %1362 = vmatpush.bf16.msra.mxu2 %v1344_v53  ;;  %1381 = vmatpush.bf16.msra.mxu3 %v1345_v52  ;;  %v955_v10 = vpop.f32.mrf.mxu2  ;;  %v974_v42 = vpop.f32.mrf.mxu3  ;;  %v2663_v52 = vld [vmem:[#allocation14_spill] sm:$0xff] }
 0x3cd   : > { %v975_v12 = vadd.f32 %v974_v42, %v955_v10  ;;  %v1486_v49 = vunpack.c.l.b16 %v2663_v52  ;;  %v1487_v50 = vunpack.c.h.b16 %v2663_v52  ;;  %v2664_v42 = vld [vmem:[#allocation11_spill] sm:$0xff] }
 0x3cf   : > { %v1215_v18 = vpack.c.bf16 %v975_v12, %v975_v12  ;;  %v1492_v26 = vpack.c.b16 %v1488_v3, %v1486_v49  ;;  %v1493_v38 = vpack.c.b16 %v1489_v48, %v1487_v50 }
 0x3d0   : > { %1363 = vmatpush.bf16.msra.mxu2 %v2230_v61  ;;  %1382 = vmatpush.bf16.msra.mxu3 %v2232_v62  ;;  %v1214_v61 = vpack.c.bf16 %v972_v17, %v972_v17 }
 0x3d1   : > { %v1251_v5 = vunpack.c.l.b16 %v1215_v18 }
 0x3d2   : > { %v1250_v40 = vunpack.c.l.b16 %v1214_v61 }
 0x3d3   : > { %1188 = vmatmul.bf16.gmra.mxu2 %v1149_v28  ;;  %1207 = vmatmul.bf16.gmra.mxu3 %v1150_v31  ;;  %v1482_v28 = vunpack.c.l.b16 %v2664_v42  ;;  %v1483_v31 = vunpack.c.h.b16 %v2664_v42 }
 0x3d4   : > { %v957_v59 = vpop.f32.mrf.mxu2  ;;  %v976_v62 = vpop.f32.mrf.mxu3  ;;  %v1253_v23 = vpack.c.b16 %v1250_v40, %v1249_v20 }
 0x3d5   : > { %v977_v7 = vadd.f32 %v976_v62, %v957_v59  ;;  %v1490_v30 = vpack.c.b16 %v1484_v14, %v1482_v28  ;;  %v1491_v17 = vpack.c.b16 %v1485_v37, %v1483_v31 }
 0x3d7   : > { %v1216_v63 = vpack.c.bf16 %v977_v7, %v977_v7 }
 0x3d9   : > { %v1252_v34 = vunpack.c.l.b16 %v1216_v63 }
 0x3db   : > { %v1254_v44 = vpack.c.b16 %v1252_v34, %v1251_v5 }
 0x3dc   : > { %v1028_v46 = vpop.f32.mrf.mxu2  ;;  %v1047_v47 = vpop.f32.mrf.mxu3 }
 0x3dd   : > { %v1048_v4 = vadd.f32 %v1047_v47, %v1028_v46 }
 0x3df   : > { %v1217_v56 = vpack.c.bf16 %v1048_v4, %v1048_v4 }
 0x3e1   : > { %v1324_v41 = vunpack.c.l.b16 %v1217_v56 }
 0x3e3   : > { %1749 = vmatmul.msk.bf16.vlgmr.msrb.gmra.mxu2 %vm1275_vm2, %v1253_v23  ;;  %1751 = vmatmul.msk.bf16.vlgmr.msrb.gmra.mxu3 %vm1275_vm2, %v1253_v23 }
 0x3e4   : > { %1436 = vmatpush.bf16.msrb.mxu2 %v1418_v51  ;;  %1455 = vmatpush.bf16.msrb.mxu3 %v1419_v58  ;;  %v1030_v43 = vpop.f32.mrf.mxu2  ;;  %v1049_v32 = vpop.f32.mrf.mxu3 }
 0x3e5   : > { %v1050_v33 = vadd.f32 %v1049_v32, %v1030_v43 }
 0x3e7   : > { %v1218_v55 = vpack.c.bf16 %v1050_v33, %v1050_v33 }
 0x3e8   : > { %1437 = vmatpush.bf16.msrb.mxu2 %v1416_v11  ;;  %1456 = vmatpush.bf16.msrb.mxu3 %v1417_v60 }
 0x3e9   : > { %v1325_v16 = vunpack.c.l.b16 %v1218_v55 }
 0x3eb   : > { %v1328_v53 = vpack.c.b16 %v1325_v16, %v1324_v41 }
 0x3ec   : > { %v1033_v6 = vpop.f32.mrf.mxu2  ;;  %v1052_v36 = vpop.f32.mrf.mxu3 }
 0x3ed   : > { %v1053_v22 = vadd.f32 %v1052_v36, %v1033_v6 }
 0x3ef   : > { %v1219_v29 = vpack.c.bf16 %v1053_v22, %v1053_v22 }
 0x3f1   : > { %v1326_v59 = vunpack.c.l.b16 %v1219_v29 }
 0x3f3   : > { %1750 = vmatmul.msk.bf16.gmra.mxu2 %vm1275_vm2, %v1254_v44  ;;  %1752 = vmatmul.msk.bf16.gmra.mxu3 %vm1275_vm2, %v1254_v44 }
 0x3f4   : > { %v1035_v1 = vpop.f32.mrf.mxu2  ;;  %v1054_v27 = vpop.f32.mrf.mxu3 }
 0x3f5   : > { %v1055_v10 = vadd.f32 %v1054_v27, %v1035_v1 }
 0x3f7   : > { %v1220_v61 = vpack.c.bf16 %v1055_v10, %v1055_v10 }
 0x3f9   : > { %v1327_v62 = vunpack.c.l.b16 %v1220_v61 }
 0x3fb   : > { %v1329_v19 = vpack.c.b16 %v1327_v62, %v1326_v59 }
 0x403   : > { %1753 = vmatmul.msk.bf16.vlgmr.msra.gmra.mxu2 %vm1275_vm2, %v1328_v53  ;;  %1755 = vmatmul.msk.bf16.vlgmr.msra.gmra.mxu3 %vm1275_vm2, %v1328_v53 }
 0x404   : > { %1510 = vmatpush.bf16.msra.mxu2 %v1492_v26  ;;  %1529 = vmatpush.bf16.msra.mxu3 %v1493_v38 }
 0x408   : > { %1511 = vmatpush.bf16.msra.mxu2 %v1490_v30  ;;  %1530 = vmatpush.bf16.msra.mxu3 %v1491_v17 }
 0x413   : > { %1754 = vmatmul.msk.bf16.gmra.mxu2 %vm1275_vm2, %v1329_v19  ;;  %1756 = vmatmul.msk.bf16.gmra.mxu3 %vm1275_vm2, %v1329_v19 }
 0x426   : > { %v1106_v20 = vpop.f32.mrf.mxu2  ;;  %v1125_v40 = vpop.f32.mrf.mxu3 }
 0x427   : > { %v1126_v0 = vadd.f32 %v1125_v40, %v1106_v20 }
 0x429   : > { %v1221_v23 = vpack.c.bf16 %v1126_v0, %v1126_v0 }
 0x42b   : > { %v1398_v45 = vunpack.c.l.b16 %v1221_v23 }
 0x42e   : > { %v1108_v57 = vpop.f32.mrf.mxu2  ;;  %v1127_v24 = vpop.f32.mrf.mxu3 }
 0x42f   : > { %v1128_v39 = vadd.f32 %v1127_v24, %v1108_v57 }
 0x431   : > { %v1222_v35 = vpack.c.bf16 %v1128_v39, %v1128_v39 }
 0x433   : > { %v1399_v54 = vunpack.c.l.b16 %v1222_v35 }
 0x435   : > { %v1402_v51 = vpack.c.b16 %v1399_v54, %v1398_v45 }
 0x436   : > { %v1111_v58 = vpop.f32.mrf.mxu2  ;;  %v1130_v46 = vpop.f32.mrf.mxu3 }
 0x437   : > { %1757 = vmatmul.msk.bf16.vlgmr.msrb.gmra.mxu2 %vm1275_vm2, %v1402_v51  ;;  %1759 = vmatmul.msk.bf16.vlgmr.msrb.gmra.mxu3 %vm1275_vm2, %v1402_v51  ;;  %v1131_v47 = vadd.f32 %v1130_v46, %v1111_v58 }
 0x439   : > { %v1223_v8 = vpack.c.bf16 %v1131_v47, %v1131_v47 }
 0x43b   : > { %v1400_v60 = vunpack.c.l.b16 %v1223_v8 }
 0x43e   : > { %v1113_v12 = vpop.f32.mrf.mxu2  ;;  %v1132_v7 = vpop.f32.mrf.mxu3 }
 0x43f   : > { %v1133_v13 = vadd.f32 %v1132_v7, %v1113_v12 }
 0x441   : > { %v1224_v11 = vpack.c.bf16 %v1133_v13, %v1133_v13 }
 0x443   : > { %v1401_v18 = vunpack.c.l.b16 %v1224_v11 }
 0x445   : > { %v1403_v63 = vpack.c.b16 %v1401_v18, %v1400_v60 }
 0x446   : > { %v1184_v5 = vpop.f32.mrf.mxu2  ;;  %v1203_v34 = vpop.f32.mrf.mxu3 }
 0x447   : > { %1758 = vmatmul.msk.bf16.gmra.mxu2 %vm1275_vm2, %v1403_v63  ;;  %1760 = vmatmul.msk.bf16.gmra.mxu3 %vm1275_vm2, %v1403_v63  ;;  %v1204_v43 = vadd.f32 %v1203_v34, %v1184_v5  ;;  %v1559_v5 = vld [vmem:[%s2646_s3] sm:$0xff]  ;;  %v2063_v34 = vmov 0  }
 0x448   : > { %1832 = vset.pattern.permute.xlu1 %v2063_v34  ;;  %1833 = vset.pattern.permute.xlu0 %v2063_v34 }
 0x449   : > { %v1225_v4 = vpack.c.bf16 %v1204_v43, %v1204_v43  ;;  %1562 = vperm.xlu1 %1832, %v1559_v5  }
 0x44b   : > { %v1472_v36 = vunpack.c.l.b16 %v1225_v4 }
 0x44e   : > { %v1186_v32 = vpop.f32.mrf.mxu2  ;;  %v1205_v44 = vpop.f32.mrf.mxu3 }
 0x44f   : > { %v1206_v33 = vadd.f32 %v1205_v44, %v1186_v32 }
 0x451   : > { %v1226_v6 = vpack.c.bf16 %v1206_v33, %v1206_v33 }
 0x453   : > { %v1473_v56 = vunpack.c.l.b16 %v1226_v6 }
 0x455   : > { %v1476_v55 = vpack.c.b16 %v1473_v56, %v1472_v36  ;;  %v1542_v36 = vld [vmem:[%s2645_s2] sm:$0xf] }
 0x456   : > { %v1189_v15 = vpop.f32.mrf.mxu2  ;;  %v1208_v21 = vpop.f32.mrf.mxu3 }
 0x457   : > { %1761 = vmatmul.msk.bf16.vlgmr.msra.gmra.mxu2 %vm1275_vm2, %v1476_v55  ;;  %1763 = vmatmul.msk.bf16.vlgmr.msra.gmra.mxu3 %vm1275_vm2, %v1476_v55  ;;  %v1209_v41 = vadd.f32 %v1208_v21, %v1189_v15 }
 0x459   : > { %v1227_v9 = vpack.c.bf16 %v1209_v41, %v1209_v41 }
 0x45b   : > { %v1474_v48 = vunpack.c.l.b16 %v1227_v9 }
 0x45e   : > { %v1191_v16 = vpop.f32.mrf.mxu2  ;;  %v1210_v25 = vpop.f32.mrf.mxu3 }
 0x45f   : > { %v1211_v2 = vadd.f32 %v1210_v25, %v1191_v16 }
 0x461   : > { %v1228_v3 = vpack.c.bf16 %v1211_v2, %v1211_v2 }
 0x463   : > { %v1475_v53 = vunpack.c.l.b16 %v1228_v3 }
 0x465   : > { %v1477_v52 = vpack.c.b16 %v1475_v53, %v1474_v48 }
 0x466   : > { %v2589_v49 = vpop.f32.mrf.mxu2  ;;  %v2591_v50 = vpop.f32.mrf.mxu3 }
 0x467   : > { %1762 = vmatmul.msk.bf16.gmra.mxu2 %vm1275_vm2, %v1477_v52  ;;  %1764 = vmatmul.msk.bf16.gmra.mxu3 %vm1275_vm2, %v1477_v52 }
 0x46e   : > { %v2595_v1 = vpop.f32.mrf.mxu2  ;;  %v2597_v27 = vpop.f32.mrf.mxu3 }
 0x46f   : > { %v1543_v14 = vpack.c.bf16 %v2595_v1, %v2589_v49  ;;  %v1544_v37 = vpack.c.bf16 %v2597_v27, %v2591_v50 }
 0x476   : > { %v1296_v26 = vpop.f32.mrf.mxu2  ;;  %v1315_v38 = vpop.f32.mrf.mxu3 }
 0x47e   : > { %v1298_v22 = vpop.f32.mrf.mxu2  ;;  %v1317_v10 = vpop.f32.mrf.mxu3 }
 0x47f   : > { %v1545_v42 = vpack.c.bf16 %v1298_v22, %v1296_v26  ;;  %v1546_v28 = vpack.c.bf16 %v1317_v10, %v1315_v38 }
 0x486   : > { %v1365_v31 = vpop.f32.mrf.mxu2  ;;  %v1384_v30 = vpop.f32.mrf.mxu3 }
 0x48e   : > { %v1367_v17 = vpop.f32.mrf.mxu2  ;;  %v1386_v29 = vpop.f32.mrf.mxu3 }
 0x48f   : > { %v1547_v61 = vpack.c.bf16 %v1367_v17, %v1365_v31  ;;  %v1548_v59 = vpack.c.bf16 %v1386_v29, %v1384_v30 }
 0x496   : > { %v1370_v62 = vpop.f32.mrf.mxu2  ;;  %v1389_v19 = vpop.f32.mrf.mxu3 }
 0x49e   : > { %v1372_v20 = vpop.f32.mrf.mxu2  ;;  %v1391_v40 = vpop.f32.mrf.mxu3 }
 0x49f   : > { %v1549_v0 = vpack.c.bf16 %v1372_v20, %v1370_v62  ;;  %v1550_v57 = vpack.c.bf16 %v1391_v40, %v1389_v19 }
 0x4ba   : > { %v1439_v24 = vpop.f32.mrf.mxu2  ;;  %v1458_v23 = vpop.f32.mrf.mxu3 }
 0x4bb   : > { %v1563_v56 = vpop.permute.xlu1 %1562 }
 0x4c2   : > { %v1441_v39 = vpop.f32.mrf.mxu2  ;;  %v1460_v35 = vpop.f32.mrf.mxu3 }
 0x4c3   : > { %v1551_v33 = vpack.c.bf16 %v1441_v39, %v1439_v24  ;;  %v1552_v6 = vpack.c.bf16 %v1460_v35, %v1458_v23 }
 0x4ca   : > { %v1444_v45 = vpop.f32.mrf.mxu2  ;;  %v1463_v54 = vpop.f32.mrf.mxu3 }
 0x4d2   : > { %v1446_v51 = vpop.f32.mrf.mxu2  ;;  %v1465_v58 = vpop.f32.mrf.mxu3 }
 0x4d3   : > { %v1553_v44 = vpack.c.bf16 %v1446_v51, %v1444_v45  ;;  %v1554_v4 = vpack.c.bf16 %v1465_v58, %v1463_v54 }
 0x4da   : > { %v1513_v46 = vpop.f32.mrf.mxu2  ;;  %v1532_v47 = vpop.f32.mrf.mxu3 }
 0x4e2   : > { %v1515_v12 = vpop.f32.mrf.mxu2  ;;  %v1534_v7 = vpop.f32.mrf.mxu3 }
 0x4e3   : > { %v1555_v43 = vpack.c.bf16 %v1515_v12, %v1513_v46  ;;  %v1556_v32 = vpack.c.bf16 %v1534_v7, %v1532_v47 }
 0x4ea   : > { %v1518_v8 = vpop.f32.mrf.mxu2  ;;  %v1537_v13 = vpop.f32.mrf.mxu3 }
 0x4f2   : > { %v1520_v11 = vpop.f32.mrf.mxu2  ;;  %v1539_v60 = vpop.f32.mrf.mxu3 }
 0x4f3   : > { %v1557_v18 = vpack.c.bf16 %v1520_v11, %v1518_v8  ;;  %v1558_v63 = vpack.c.bf16 %v1539_v60, %v1537_v13 }
 0x4f5   : > { %1565 = vmatpush.bf16.msrb.mxu2 %v1557_v18  ;;  %1578 = vmatpush.bf16.msrb.mxu3 %v1558_v63 }
 0x4f9   : > { %1566 = vmatpush.bf16.msrb.mxu2 %v1555_v43  ;;  %1579 = vmatpush.bf16.msrb.mxu3 %v1556_v32 }
 0x4fd   : > { %1567 = vmatpush.bf16.msrb.mxu2 %v1553_v44  ;;  %1580 = vmatpush.bf16.msrb.mxu3 %v1554_v4 }
 0x501   : > { %1568 = vmatpush.bf16.msrb.mxu2 %v1551_v33  ;;  %1581 = vmatpush.bf16.msrb.mxu3 %v1552_v6 }
 0x505   : > { %1569 = vmatpush.bf16.msrb.mxu2 %v1549_v0  ;;  %1582 = vmatpush.bf16.msrb.mxu3 %v1550_v57 }
 0x509   : > { %1570 = vmatpush.bf16.msrb.mxu2 %v1547_v61  ;;  %1583 = vmatpush.bf16.msrb.mxu3 %v1548_v59 }
 0x50d   : > { %1571 = vmatpush.bf16.msrb.mxu2 %v1545_v42  ;;  %1584 = vmatpush.bf16.msrb.mxu3 %v1546_v28 }
 0x511   : > { %1572 = vmatpush.bf16.msrb.mxu2 %v1543_v14  ;;  %1585 = vmatpush.bf16.msrb.mxu3 %v1544_v37 }
 0x514   : > { %1573 = vmatmul.bf16.vlgmr.msrb.gmra.mxu2 %v1542_v36  ;;  %1586 = vmatmul.bf16.vlgmr.msrb.gmra.mxu3 %v1542_v36 }
 0x597   : > { %v1574_v55 = vpop.f32.mrf.mxu2  ;;  %v1587_v15 = vpop.f32.mrf.mxu3 }
 0x598   : > { %v1575_v21 = vadd.f32 %v1574_v55, %v1563_v56  ;;  %v1588_v41 = vadd.f32 %v1587_v15, %v1563_v56 }
 0x59a   : > { %1591 = vst [vmem:[%s230_s5] sm:$0xff] %v1575_v21 }
 0x59b   : > { %1592 = vst [vmem:[%s230_s5 + $0x8] sm:$0xff] %v1588_v41 }
 0x59c   : > { %2017 = shalt.err (!%p2014_p11)
}
 0x59d   : > { %1780 = dma.vmem_to_hbm [thread:$0]  (%p2155_p3), %s1608_s9, 256, %s1610_s10, %s1594_s11  }
 0x59f   : > { %v1576_v16 = vpop.f32.mrf.mxu2  ;;  %v1589_v25 = vpop.f32.mrf.mxu3 }
 0x5a0 PF: > { %s1621_s8 = sand.u32 1, %s2048_s15   ;;  %p2665_p12 = scmp.ge.s32.totalorder %s2060_s18, 2 }
 0x5a1   : > { %s1622_s23 = scalar_lea.sflag [#allocation4], %s1621_s8 }
 0x5a2   : > { %p1791_p13 = pnand %p2665_p12, %p2124_p6 }
 0x5a4   : > { %p1792_p0 = pneg %p1791_p13 }
 0x5a6   : > { %2043 = dma.done.wait (%p1792_p0), %s1622_s23, 256  }
 0x5a7   : > { %2045 = vsyncadd (%p1792_p0), %s1622_s23, 4294967040  ;;  %p18_p3 = scmp.ge.s32.totalorder %s2142_s29, 4   ;;  %s2666_s15 = smov %s2052_s16 }
 0x5a8   : > { %s2667_s16 = smov %s2056_s17  ;;  %s2668_s17 = smov %s2151_s6 }
 0x5a9   : > { %s2669_s18 = smov %s2142_s29  ;;  %20 = sbr.rel (!%p18_p3) target bundleno = 6 (0x6), region = 85 }
 0x5ae   :  { %1628 = vsyncpa [#allocation3], 1 }
 0x5af   :  { %1630 = vsyncpa [#allocation3 + $0x1], 1 }
 0x5b0   :  { %1631 = vsyncpa [#allocation6], 1 }
 0x5b1   :  { %1632 = vsyncpa [#allocation4], 1 }
 0x5b2   :  { %1634 = vsyncpa [#allocation4 + $0x1], 1 }

</bundles_post_ra>
